<compile_context>
chip_gen: v7x
topology: tpu7x:2x2x1
jax: 0.10.0
libtpu: 0.0.40
codegen_flags: <defaults>
</compile_context>

<pallas_src>
import functools
import math

import jax
import jax.numpy as jnp
from jax.experimental import pallas as pl
from jax.experimental.pallas import tpu as pltpu


# ----------------------------------------------------------------------------
# Fused kernel: one grid step = TB batch elements' full forward pass.
# ----------------------------------------------------------------------------
def embed_x_kernel(
    x_ref,                                  # (TB, Np, Cp) bf16
    we_ref, be_ref,                         # embedding: (Cp, Dp) bf16, (1, Dp) f32
    w1a_ref, b1a_ref, w1b_ref, b1b_ref,     # fc1: (Dp,Dhp),(1,Dhp),(Dhp,Dp),(1,Dp)
    wag_ref, bag_ref,                       # fused GAPool gates: (Dp, 2*Dp), (1, 2*Dp)
    wc_ref,                                 # GAPool score: (Dp, 1)   (bc dropped: softmax-invariant)
    w2a_ref, b2a_ref, w2b_ref, b2b_ref,     # fc2: (Dp,Dhp),(1,Dhp),(Dhp,Dp),(1,Dp)
    out_ref,                                # (TB, Dp) f32
    *, n_valid,
):
    tb, n, cp = x_ref.shape
    dp = out_ref.shape[-1]

    # Flatten (TB, Np) -> TB*Np rows (free: Np is a multiple of 8).
    x = x_ref[...].reshape(tb * n, cp)                                  # bf16

    # embedding: [rows, Cp] -> [rows, Dp]  (bf16 MXU, f32 accumulation)
    emb = jnp.dot(x, we_ref[...], preferred_element_type=jnp.float32) + be_ref[...]

    # fc1: Linear(D, D/2) -> ReLU -> (Dropout: identity) -> Linear(D/2, D)
    h1 = jnp.maximum(
        jnp.dot(emb.astype(jnp.bfloat16), w1a_ref[...],
                preferred_element_type=jnp.float32) + b1a_ref[...],
        0.0,
    )
    fc_ins = (
        jnp.dot(h1.astype(jnp.bfloat16), w1b_ref[...],
                preferred_element_type=jnp.float32) + b1b_ref[...]
    )                                                                   # (rows, Dp) f32

    fc_b = fc_ins.astype(jnp.bfloat16)   # reused below; f32 fc_ins dies early

    # GAPool: fused tanh|sigmoid gate projection (one wide MXU matmul).
    ag = jnp.dot(fc_b, wag_ref[...], preferred_element_type=jnp.float32) + bag_ref[...]
    a = jnp.tanh(ag[:, :dp])
    g = jax.nn.sigmoid(ag[:, dp:])

    # Score reduction as an MXU matmul: (rows, Dp) @ (Dp, 1) -> (rows, 1)
    scores = jnp.dot((a * g).astype(jnp.bfloat16), wc_ref[...],
                     preferred_element_type=jnp.float32)

    # Per-batch-element softmax over tokens (padded tokens masked out).
    scores3 = scores.reshape(tb, n, 1)
    if n_valid < n:
        tok = jax.lax.broadcasted_iota(jnp.int32, (tb, n, 1), 1)
        scores3 = jnp.where(tok < n_valid, scores3, -1e30)
    scores3 = scores3 - jnp.max(scores3, axis=1, keepdims=True)
    p = jnp.exp(scores3)
    attn = p * pl.reciprocal(jnp.sum(p, axis=1, keepdims=True), approx=True)

    fc3 = fc_b.reshape(tb, n, dp)                                       # bf16 view
    emb_bag = jnp.sum(attn * fc3, axis=1)                               # (TB, Dp) f32

    # fc2: Linear(D, D/2) -> ReLU -> (Dropout: identity) -> Linear(D/2, D)
    h2 = jnp.maximum(
        jnp.dot(emb_bag.astype(jnp.bfloat16), w2a_ref[...],
                preferred_element_type=jnp.float32) + b2a_ref[...],
        0.0,
    )
    out_ref[...] = (
        jnp.dot(h2.astype(jnp.bfloat16), w2b_ref[...],
                preferred_element_type=jnp.float32) + b2b_ref[...]
    )


# ----------------------------------------------------------------------------
# Wrapper helpers.
# ----------------------------------------------------------------------------
def _round_up(v, m):
    return (v + m - 1) // m * m


def _pad2(w, rows, cols):
    return jnp.pad(w, ((0, rows - w.shape[0]), (0, cols - w.shape[1])))


def _lane_multiple():
    """256-wide MXU on v6e/v7x; 128 on v5e and unknown chips."""
    try:
        kind = jax.devices()[0].device_kind.lower()
        if "v6" in kind or "v7" in kind:
            return 256
    except Exception:
        pass
    return 128


def _pick_batch_tile(B, N, target_rows=512):
    """TB must be a multiple of 8 (or == B) so the (TB, Dp) output block meets the
    (8,128) constraint; prefer TB < B so the parallel batch axis has >=2 steps."""
    cands = [d for d in range(1, B + 1) if B % d == 0 and (d % 8 == 0 or d == B)]
    fit = [d for d in cands if d * N <= max(target_rows, N)]
    multi = [d for d in fit if d < B]
    if multi:
        return max(multi)
    if fit:
        return max(fit)
    return min(cands)


def _vmem_limit_bytes(weights, TB, Np, Cp, Dp, Dhp, weight_bufs):
    """Generation-aware scoped-VMEM limit derived from actual resident buffers."""
    wbytes = sum(int(w.size) * w.dtype.itemsize for w in weights) * weight_bufs
    x_bytes = 2 * TB * Np * Cp * 2            # bf16 activation block, double-buffered
    out_bytes = 2 * TB * Dp * 4               # f32 output block, double-buffered
    rows = TB * Np
    inter = rows * (8 * Dp + 2 * Dhp) * 4     # rough bound on live f32 intermediates
    est = wbytes + x_bytes + out_bytes + inter
    return int(min(max(2 * est + (8 << 20), 32 << 20), 56 << 20))


def prepare_params(params, lane_multiple=None):
    """Pad + cast weights ONCE (hoisted out of the per-call path)."""
    if lane_multiple is None:
        lane_multiple = _lane_multiple()
    C, D = params["w_emb"].shape
    Dh = params["w1a"].shape[1]
    Cp = _round_up(C, lane_multiple)
    Dp = _round_up(D, lane_multiple)
    Dhp = _round_up(Dh, lane_multiple)
    wdt = jnp.bfloat16   # MXU operand dtype (f32 accumulation inside the kernel)

    # Fused gate projection weight/bias: [wa | wg], [ba | bg].
    wag = jnp.concatenate([_pad2(params["wa"], Dp, Dp),
                           _pad2(params["wg"], Dp, Dp)], axis=1)
    bag = jnp.concatenate([_pad2(params["ba"], 1, Dp),
                           _pad2(params["bg"], 1, Dp)], axis=1)

    weights = [
        _pad2(params["w_emb"], Cp, Dp).astype(wdt), _pad2(params["b_emb"], 1, Dp).astype(jnp.float32),
        _pad2(params["w1a"], Dp, Dhp).astype(wdt),  _pad2(params["b1a"], 1, Dhp).astype(jnp.float32),
        _pad2(params["w1b"], Dhp, Dp).astype(wdt),  _pad2(params["b1b"], 1, Dp).astype(jnp.float32),
        wag.astype(wdt),                            bag.astype(jnp.float32),
        _pad2(params["wc"], Dp, 1).astype(wdt),     # bc dropped (softmax-invariant)
        _pad2(params["w2a"], Dp, Dhp).astype(wdt),  _pad2(params["b2a"], 1, Dhp).astype(jnp.float32),
        _pad2(params["w2b"], Dhp, Dp).astype(wdt),  _pad2(params["b2b"], 1, Dp).astype(jnp.float32),
    ]
    return {"weights": weights, "C": C, "D": D, "Cp": Cp, "Dp": Dp, "Dhp": Dhp}


def embed_x_forward(x, prepared):
    """x: [B, N, C] float32 -> [B, D] float32 (prepared = prepare_params(params))."""
    B, N, C = x.shape
    assert C == prepared["C"], (C, prepared["C"])
    weights = prepared["weights"]
    Cp, Dp, Dhp, D = prepared["Cp"], prepared["Dp"], prepared["Dhp"], prepared["D"]

    Np = _round_up(N, 8)   # sublane alignment: in-kernel reshapes stay free
    x_p = jnp.pad(x, ((0, 0), (0, Np - N), (0, Cp - C))).astype(jnp.bfloat16)

    TB = _pick_batch_tile(B, Np)
    kernel = functools.partial(embed_x_kernel, n_valid=N)

    def build(single_buffer_weights):
        def const_spec(arr):
            nd = arr.ndim
            if single_buffer_weights:
                return pl.BlockSpec(arr.shape, lambda b, _nd=nd: (0,) * _nd,
                                    pipeline_mode=pl.Buffered(1))
            return pl.BlockSpec(arr.shape, lambda b, _nd=nd: (0,) * _nd)

        in_specs = [pl.BlockSpec((TB, Np, Cp), lambda b: (b, 0, 0))]
        in_specs += [const_spec(w) for w in weights]
        out_specs = pl.BlockSpec((TB, Dp), lambda b: (b, 0))

        vmem_limit = _vmem_limit_bytes(weights, TB, Np, Cp, Dp, Dhp,
                                       weight_bufs=1 if single_buffer_weights else 2)
        return pl.pallas_call(
            kernel,
            out_shape=jax.ShapeDtypeStruct((B, Dp), jnp.float32),
            grid=(B // TB,),
            in_specs=in_specs,
            out_specs=out_specs,
            compiler_params=pltpu.CompilerParams(
                dimension_semantics=("parallel",),      # batch tiles are independent
                vmem_limit_bytes=vmem_limit,
            ),
        )

    try:
        out = build(True)(x_p, *weights)
    except Exception:
        # Fallback if this jax/libtpu build rejects pl.Buffered(1).
        out = build(False)(x_p, *weights)

    return out[:, :D]


# ----------------------------------------------------------------------------
# Pure-JAX reference (same math, full f32) for a correctness check.
# ----------------------------------------------------------------------------
def embed_x_reference(x, p):
    emb = x @ p["w_emb"] + p["b_emb"]
    h1 = jnp.maximum(emb @ p["w1a"] + p["b1a"], 0.0)
    fc_ins = h1 @ p["w1b"] + p["b1b"]
    a = jnp.tanh(fc_ins @ p["wa"] + p["ba"])
    g = jax.nn.sigmoid(fc_ins @ p["wg"] + p["bg"])
    scores = (a * g) @ p["wc"] + p["bc"]                  # (B, N, 1)
    attn = jax.nn.softmax(scores, axis=1)
    emb_bag = jnp.sum(attn * fc_ins, axis=1)
    h2 = jnp.maximum(emb_bag @ p["w2a"] + p["b2a"], 0.0)
    return h2 @ p["w2b"] + p["b2b"]


def init_linear(key, fan_in, fan_out):
    """PyTorch-style Linear init: U(-1/sqrt(fan_in), 1/sqrt(fan_in))."""
    kw, kb = jax.random.split(key)
    bound = 1.0 / math.sqrt(fan_in)
    w = jax.random.uniform(kw, (fan_in, fan_out), jnp.float32, -bound, bound)
    b = jax.random.uniform(kb, (1, fan_out), jnp.float32, -bound, bound)
    return w, b


if __name__ == "__main__":
    B, N, C, D = 2, 8, 32, 32  # batch, tokens, in_dim, out_dim (D//2 hidden in MLPs)

    key = jax.random.PRNGKey(0)
    keys = jax.random.split(key, 9)
    x = jax.random.normal(keys[0], (B, N, C), jnp.float32)

    params = {}
    params["w_emb"], params["b_emb"] = init_linear(keys[1], C, D)
    params["w1a"], params["b1a"] = init_linear(keys[2], D, D // 2)
    params["w1b"], params["b1b"] = init_linear(keys[3], D // 2, D)
    params["wa"], params["ba"] = init_linear(keys[4], D, D)
    params["wg"], params["bg"] = init_linear(keys[5], D, D)
    params["wc"], params["bc"] = init_linear(keys[6], D, 1)   # (D, 1), (1, 1)
    params["w2a"], params["b2a"] = init_linear(keys[7], D, D // 2)
    params["w2b"], params["b2b"] = init_linear(keys[8], D // 2, D)

    prepared = prepare_params(params)   # pad + bf16-cast once (not per forward)
    out = jax.block_until_ready(embed_x_forward(x, prepared))
    ref = embed_x_reference(x, params)

    assert out.shape == (B, D), out.shape
    # Numerics contract: bf16 MXU operands (x and weights) with f32 accumulation
    # against a full-f32 reference -> modest tolerance.
    max_err = jnp.max(jnp.abs(out - ref))
    assert jnp.allclose(out, ref, atol=1e-1, rtol=1e-1), f"max abs err = {max_err}"

    print("KERNEL_OK")
</pallas_src>

<mosaic_0001>
module attributes {stable_mosaic.version = 11 : i64} {
  func.func @embed_x_kernel(%arg0: i32, %arg1: memref<2x8x128xbf16, #tpu.memory_space<vmem>>, %arg2: memref<128x128xbf16, #tpu.memory_space<vmem>>, %arg3: memref<1x128xf32, #tpu.memory_space<vmem>>, %arg4: memref<128x128xbf16, #tpu.memory_space<vmem>>, %arg5: memref<1x128xf32, #tpu.memory_space<vmem>>, %arg6: memref<128x128xbf16, #tpu.memory_space<vmem>>, %arg7: memref<1x128xf32, #tpu.memory_space<vmem>>, %arg8: memref<128x256xbf16, #tpu.memory_space<vmem>>, %arg9: memref<1x256xf32, #tpu.memory_space<vmem>>, %arg10: memref<128x1xbf16, #tpu.memory_space<vmem>>, %arg11: memref<128x128xbf16, #tpu.memory_space<vmem>>, %arg12: memref<1x128xf32, #tpu.memory_space<vmem>>, %arg13: memref<128x128xbf16, #tpu.memory_space<vmem>>, %arg14: memref<1x128xf32, #tpu.memory_space<vmem>>, %arg15: memref<2x128xf32, #tpu.memory_space<vmem>>) attributes {dimension_semantics = [#tpu.dimension_semantics<parallel>], iteration_bounds = array<i64: 1>, scalar_prefetch = 0 : i64, scratch_operands = 0 : i64, tpu.core_type = #tpu.core_type<tc>, window_params = [{transform_indices = @transform_0, window_bounds = array<i64: 2, 8, 128>}, {pipeline_mode = #tpu.pipeline_mode<synchronous>, transform_indices = @transform_1, window_bounds = array<i64: 128, 128>}, {pipeline_mode = #tpu.pipeline_mode<synchronous>, transform_indices = @transform_2, window_bounds = array<i64: 1, 128>}, {pipeline_mode = #tpu.pipeline_mode<synchronous>, transform_indices = @transform_3, window_bounds = array<i64: 128, 128>}, {pipeline_mode = #tpu.pipeline_mode<synchronous>, transform_indices = @transform_4, window_bounds = array<i64: 1, 128>}, {pipeline_mode = #tpu.pipeline_mode<synchronous>, transform_indices = @transform_5, window_bounds = array<i64: 128, 128>}, {pipeline_mode = #tpu.pipeline_mode<synchronous>, transform_indices = @transform_6, window_bounds = array<i64: 1, 128>}, {pipeline_mode = #tpu.pipeline_mode<synchronous>, transform_indices = @transform_7, window_bounds = array<i64: 128, 256>}, {pipeline_mode = #tpu.pipeline_mode<synchronous>, transform_indices = @transform_8, window_bounds = array<i64: 1, 256>}, {pipeline_mode = #tpu.pipeline_mode<synchronous>, transform_indices = @transform_9, window_bounds = array<i64: 128, 1>}, {pipeline_mode = #tpu.pipeline_mode<synchronous>, transform_indices = @transform_10, window_bounds = array<i64: 128, 128>}, {pipeline_mode = #tpu.pipeline_mode<synchronous>, transform_indices = @transform_11, window_bounds = array<i64: 1, 128>}, {pipeline_mode = #tpu.pipeline_mode<synchronous>, transform_indices = @transform_12, window_bounds = array<i64: 128, 128>}, {pipeline_mode = #tpu.pipeline_mode<synchronous>, transform_indices = @transform_13, window_bounds = array<i64: 1, 128>}, {transform_indices = @transform_14, window_bounds = array<i64: 2, 128>}]} {
    %c0 = arith.constant 0 : index
    %c0_0 = arith.constant 0 : index
    %c0_1 = arith.constant 0 : index
    %0 = vector.load %arg1[%c0, %c0_0, %c0_1] : memref<2x8x128xbf16, #tpu.memory_space<vmem>>, vector<2x8x128xbf16>
    %1 = vector.shape_cast %0 : vector<2x8x128xbf16> to vector<16x128xbf16>
    %c0_2 = arith.constant 0 : index
    %c0_3 = arith.constant 0 : index
    %2 = vector.load %arg2[%c0_2, %c0_3] : memref<128x128xbf16, #tpu.memory_space<vmem>>, vector<128x128xbf16>
    %cst = arith.constant dense<0.000000e+00> : vector<16x128xf32>
    %3 = tpu.matmul %1, %2, %cst {dimension_numbers = #tpu.dot_dimension_numbers<[1], [0], [0], [1], [0, 0, 1, 1], [], []>} : vector<16x128xbf16>, vector<128x128xbf16>, vector<16x128xf32> -> vector<16x128xf32>
    %c0_4 = arith.constant 0 : index
    %c0_5 = arith.constant 0 : index
    %4 = vector.load %arg3[%c0_4, %c0_5] : memref<1x128xf32, #tpu.memory_space<vmem>>, vector<1x128xf32>
    %5 = vector.broadcast %4 : vector<1x128xf32> to vector<16x128xf32>
    %6 = arith.addf %3, %5 : vector<16x128xf32>
    %7 = arith.truncf %6 : vector<16x128xf32> to vector<16x128xbf16>
    %c0_6 = arith.constant 0 : index
    %c0_7 = arith.constant 0 : index
    %8 = vector.load %arg4[%c0_6, %c0_7] : memref<128x128xbf16, #tpu.memory_space<vmem>>, vector<128x128xbf16>
    %cst_8 = arith.constant dense<0.000000e+00> : vector<16x128xf32>
    %9 = tpu.matmul %7, %8, %cst_8 {dimension_numbers = #tpu.dot_dimension_numbers<[1], [0], [0], [1], [0, 0, 1, 1], [], []>} : vector<16x128xbf16>, vector<128x128xbf16>, vector<16x128xf32> -> vector<16x128xf32>
    %c0_9 = arith.constant 0 : index
    %c0_10 = arith.constant 0 : index
    %10 = vector.load %arg5[%c0_9, %c0_10] : memref<1x128xf32, #tpu.memory_space<vmem>>, vector<1x128xf32>
    %11 = vector.broadcast %10 : vector<1x128xf32> to vector<16x128xf32>
    %12 = arith.addf %9, %11 : vector<16x128xf32>
    %cst_11 = arith.constant 0.000000e+00 : f32
    %13 = vector.broadcast %cst_11 : f32 to vector<16x128xf32>
    %14 = arith.maximumf %12, %13 : vector<16x128xf32>
    %15 = arith.truncf %14 : vector<16x128xf32> to vector<16x128xbf16>
    %c0_12 = arith.constant 0 : index
    %c0_13 = arith.constant 0 : index
    %16 = vector.load %arg6[%c0_12, %c0_13] : memref<128x128xbf16, #tpu.memory_space<vmem>>, vector<128x128xbf16>
    %cst_14 = arith.constant dense<0.000000e+00> : vector<16x128xf32>
    %17 = tpu.matmul %15, %16, %cst_14 {dimension_numbers = #tpu.dot_dimension_numbers<[1], [0], [0], [1], [0, 0, 1, 1], [], []>} : vector<16x128xbf16>, vector<128x128xbf16>, vector<16x128xf32> -> vector<16x128xf32>
    %c0_15 = arith.constant 0 : index
    %c0_16 = arith.constant 0 : index
    %18 = vector.load %arg7[%c0_15, %c0_16] : memref<1x128xf32, #tpu.memory_space<vmem>>, vector<1x128xf32>
    %19 = vector.broadcast %18 : vector<1x128xf32> to vector<16x128xf32>
    %20 = arith.addf %17, %19 : vector<16x128xf32>
    %21 = arith.truncf %20 : vector<16x128xf32> to vector<16x128xbf16>
    %c0_17 = arith.constant 0 : index
    %c0_18 = arith.constant 0 : index
    %22 = vector.load %arg8[%c0_17, %c0_18] : memref<128x256xbf16, #tpu.memory_space<vmem>>, vector<128x256xbf16>
    %cst_19 = arith.constant dense<0.000000e+00> : vector<16x256xf32>
    %23 = tpu.matmul %21, %22, %cst_19 {dimension_numbers = #tpu.dot_dimension_numbers<[1], [0], [0], [1], [0, 0, 1, 1], [], []>} : vector<16x128xbf16>, vector<128x256xbf16>, vector<16x256xf32> -> vector<16x256xf32>
    %c0_20 = arith.constant 0 : index
    %c0_21 = arith.constant 0 : index
    %24 = vector.load %arg9[%c0_20, %c0_21] : memref<1x256xf32, #tpu.memory_space<vmem>>, vector<1x256xf32>
    %25 = vector.broadcast %24 : vector<1x256xf32> to vector<16x256xf32>
    %26 = arith.addf %23, %25 : vector<16x256xf32>
    %27 = vector.extract_strided_slice %26 {offsets = [0, 0], sizes = [16, 128], strides = [1, 1]} : vector<16x256xf32> to vector<16x128xf32>
    %28 = math.tanh %27 : vector<16x128xf32>
    %29 = vector.extract_strided_slice %26 {offsets = [0, 128], sizes = [16, 128], strides = [1, 1]} : vector<16x256xf32> to vector<16x128xf32>
    %30 = arith.negf %29 : vector<16x128xf32>
    %31 = math.exp %30 : vector<16x128xf32>
    %cst_22 = arith.constant 1.000000e+00 : f32
    %32 = vector.broadcast %cst_22 : f32 to vector<16x128xf32>
    %33 = arith.addf %32, %31 : vector<16x128xf32>
    %34 = arith.divf %32, %33 : vector<16x128xf32>
    %35 = arith.mulf %28, %34 : vector<16x128xf32>
    %36 = arith.truncf %35 : vector<16x128xf32> to vector<16x128xbf16>
    %c0_23 = arith.constant 0 : index
    %c0_24 = arith.constant 0 : index
    %37 = vector.load %arg10[%c0_23, %c0_24] : memref<128x1xbf16, #tpu.memory_space<vmem>>, vector<128x1xbf16>
    %cst_25 = arith.constant dense<0.000000e+00> : vector<16x1xf32>
    %38 = tpu.matmul %36, %37, %cst_25 {dimension_numbers = #tpu.dot_dimension_numbers<[1], [0], [0], [1], [0, 0, 1, 1], [], []>} : vector<16x128xbf16>, vector<128x1xbf16>, vector<16x1xf32> -> vector<16x1xf32>
    %39 = vector.shape_cast %38 : vector<16x1xf32> to vector<2x8x1xf32>
    %cst_26 = arith.constant dense<0xFF800000> : vector<2x1xf32>
    %40 = vector.multi_reduction <maximumf>, %39, %cst_26 [1] : vector<2x8x1xf32> to vector<2x1xf32>
    %41 = vector.shape_cast %40 : vector<2x1xf32> to vector<2x1x1xf32>
    %42 = vector.broadcast %41 : vector<2x1x1xf32> to vector<2x8x1xf32>
    %43 = arith.subf %39, %42 : vector<2x8x1xf32>
    %44 = math.exp %43 : vector<2x8x1xf32>
    %cst_27 = arith.constant dense<0.000000e+00> : vector<2x1xf32>
    %45 = vector.multi_reduction <add>, %44, %cst_27 [1] : vector<2x8x1xf32> to vector<2x1xf32>
    %46 = vector.shape_cast %45 : vector<2x1xf32> to vector<2x1x1xf32>
    %47 = tpu.reciprocal %46 {approx = true} : vector<2x1x1xf32> -> vector<2x1x1xf32>
    %48 = vector.broadcast %47 : vector<2x1x1xf32> to vector<2x8x1xf32>
    %49 = arith.mulf %44, %48 : vector<2x8x1xf32>
    %50 = vector.shape_cast %21 : vector<16x128xbf16> to vector<2x8x128xbf16>
    %51 = arith.extf %50 : vector<2x8x128xbf16> to vector<2x8x128xf32>
    %52 = vector.broadcast %49 : vector<2x8x1xf32> to vector<2x8x128xf32>
    %53 = arith.mulf %52, %51 : vector<2x8x128xf32>
    %cst_28 = arith.constant dense<0.000000e+00> : vector<2x128xf32>
    %54 = vector.multi_reduction <add>, %53, %cst_28 [1] : vector<2x8x128xf32> to vector<2x128xf32>
    %55 = arith.truncf %54 : vector<2x128xf32> to vector<2x128xbf16>
    %c0_29 = arith.constant 0 : index
    %c0_30 = arith.constant 0 : index
    %56 = vector.load %arg11[%c0_29, %c0_30] : memref<128x128xbf16, #tpu.memory_space<vmem>>, vector<128x128xbf16>
    %cst_31 = arith.constant dense<0.000000e+00> : vector<2x128xf32>
    %57 = tpu.matmul %55, %56, %cst_31 {dimension_numbers = #tpu.dot_dimension_numbers<[1], [0], [0], [1], [0, 0, 1, 1], [], []>} : vector<2x128xbf16>, vector<128x128xbf16>, vector<2x128xf32> -> vector<2x128xf32>
    %c0_32 = arith.constant 0 : index
    %c0_33 = arith.constant 0 : index
    %58 = vector.load %arg12[%c0_32, %c0_33] : memref<1x128xf32, #tpu.memory_space<vmem>>, vector<1x128xf32>
    %59 = vector.broadcast %58 : vector<1x128xf32> to vector<2x128xf32>
    %60 = arith.addf %57, %59 : vector<2x128xf32>
    %cst_34 = arith.constant 0.000000e+00 : f32
    %61 = vector.broadcast %cst_34 : f32 to vector<2x128xf32>
    %62 = arith.maximumf %60, %61 : vector<2x128xf32>
    %63 = arith.truncf %62 : vector<2x128xf32> to vector<2x128xbf16>
    %c0_35 = arith.constant 0 : index
    %c0_36 = arith.constant 0 : index
    %64 = vector.load %arg13[%c0_35, %c0_36] : memref<128x128xbf16, #tpu.memory_space<vmem>>, vector<128x128xbf16>
    %cst_37 = arith.constant dense<0.000000e+00> : vector<2x128xf32>
    %65 = tpu.matmul %63, %64, %cst_37 {dimension_numbers = #tpu.dot_dimension_numbers<[1], [0], [0], [1], [0, 0, 1, 1], [], []>} : vector<2x128xbf16>, vector<128x128xbf16>, vector<2x128xf32> -> vector<2x128xf32>
    %c0_38 = arith.constant 0 : index
    %c0_39 = arith.constant 0 : index
    %66 = vector.load %arg14[%c0_38, %c0_39] : memref<1x128xf32, #tpu.memory_space<vmem>>, vector<1x128xf32>
    %67 = vector.broadcast %66 : vector<1x128xf32> to vector<2x128xf32>
    %68 = arith.addf %65, %67 : vector<2x128xf32>
    %c0_40 = arith.constant 0 : index
    %c0_41 = arith.constant 0 : index
    %69 = vector.load %arg15[%c0_40, %c0_41] : memref<2x128xf32, #tpu.memory_space<vmem>>, vector<2x128xf32>
    tpu.vector_store %arg15[%c0_40, %c0_41], %68 {strides = array<i32>} : memref<2x128xf32, #tpu.memory_space<vmem>>, vector<2x128xf32>,
    return
  }
  func.func @transform_0(%arg0: i32) -> (i32, i32, i32) {
    %c0_i32 = arith.constant 0 : i32
    %c0_i32_0 = arith.constant 0 : i32
    %c0_i32_1 = arith.constant 0 : i32
    return %arg0, %c0_i32, %c0_i32_0 : i32, i32, i32
  }
  func.func @transform_1(%arg0: i32) -> (i32, i32) {
    %c0_i32 = arith.constant 0 : i32
    %c0_i32_0 = arith.constant 0 : i32
    %c0_i32_1 = arith.constant 0 : i32
    return %c0_i32, %c0_i32_0 : i32, i32
  }
  func.func @transform_2(%arg0: i32) -> (i32, i32) {
    %c0_i32 = arith.constant 0 : i32
    %c0_i32_0 = arith.constant 0 : i32
    %c0_i32_1 = arith.constant 0 : i32
    return %c0_i32, %c0_i32_0 : i32, i32
  }
  func.func @transform_3(%arg0: i32) -> (i32, i32) {
    %c0_i32 = arith.constant 0 : i32
    %c0_i32_0 = arith.constant 0 : i32
    %c0_i32_1 = arith.constant 0 : i32
    return %c0_i32, %c0_i32_0 : i32, i32
  }
  func.func @transform_4(%arg0: i32) -> (i32, i32) {
    %c0_i32 = arith.constant 0 : i32
    %c0_i32_0 = arith.constant 0 : i32
    %c0_i32_1 = arith.constant 0 : i32
    return %c0_i32, %c0_i32_0 : i32, i32
  }
  func.func @transform_5(%arg0: i32) -> (i32, i32) {
    %c0_i32 = arith.constant 0 : i32
    %c0_i32_0 = arith.constant 0 : i32
    %c0_i32_1 = arith.constant 0 : i32
    return %c0_i32, %c0_i32_0 : i32, i32
  }
  func.func @transform_6(%arg0: i32) -> (i32, i32) {
    %c0_i32 = arith.constant 0 : i32
    %c0_i32_0 = arith.constant 0 : i32
    %c0_i32_1 = arith.constant 0 : i32
    return %c0_i32, %c0_i32_0 : i32, i32
  }
  func.func @transform_7(%arg0: i32) -> (i32, i32) {
    %c0_i32 = arith.constant 0 : i32
    %c0_i32_0 = arith.constant 0 : i32
    %c0_i32_1 = arith.constant 0 : i32
    return %c0_i32, %c0_i32_0 : i32, i32
  }
  func.func @transform_8(%arg0: i32) -> (i32, i32) {
    %c0_i32 = arith.constant 0 : i32
    %c0_i32_0 = arith.constant 0 : i32
    %c0_i32_1 = arith.constant 0 : i32
    return %c0_i32, %c0_i32_0 : i32, i32
  }
  func.func @transform_9(%arg0: i32) -> (i32, i32) {
    %c0_i32 = arith.constant 0 : i32
    %c0_i32_0 = arith.constant 0 : i32
    %c0_i32_1 = arith.constant 0 : i32
    return %c0_i32, %c0_i32_0 : i32, i32
  }
  func.func @transform_10(%arg0: i32) -> (i32, i32) {
    %c0_i32 = arith.constant 0 : i32
    %c0_i32_0 = arith.constant 0 : i32
    %c0_i32_1 = arith.constant 0 : i32
    return %c0_i32, %c0_i32_0 : i32, i32
  }
  func.func @transform_11(%arg0: i32) -> (i32, i32) {
    %c0_i32 = arith.constant 0 : i32
    %c0_i32_0 = arith.constant 0 : i32
    %c0_i32_1 = arith.constant 0 : i32
    return %c0_i32, %c0_i32_0 : i32, i32
  }
  func.func @transform_12(%arg0: i32) -> (i32, i32) {
    %c0_i32 = arith.constant 0 : i32
    %c0_i32_0 = arith.constant 0 : i32
    %c0_i32_1 = arith.constant 0 : i32
    return %c0_i32, %c0_i32_0 : i32, i32
  }
  func.func @transform_13(%arg0: i32) -> (i32, i32) {
    %c0_i32 = arith.constant 0 : i32
    %c0_i32_0 = arith.constant 0 : i32
    %c0_i32_1 = arith.constant 0 : i32
    return %c0_i32, %c0_i32_0 : i32, i32
  }
  func.func @transform_14(%arg0: i32) -> (i32, i32) {
    %c0_i32 = arith.constant 0 : i32
    %c0_i32_0 = arith.constant 0 : i32
    return %arg0, %c0_i32 : i32, i32
  }
}

module attributes {stable_mosaic.version = 11 : i64} {
  func.func @embed_x_kernel(%arg0: i32, %arg1: memref<2x8x128xbf16, #tpu.memory_space<vmem>>, %arg2: memref<128x128xbf16, #tpu.memory_space<vmem>>, %arg3: memref<1x128xf32, #tpu.memory_space<vmem>>, %arg4: memref<128x128xbf16, #tpu.memory_space<vmem>>, %arg5: memref<1x128xf32, #tpu.memory_space<vmem>>, %arg6: memref<128x128xbf16, #tpu.memory_space<vmem>>, %arg7: memref<1x128xf32, #tpu.memory_space<vmem>>, %arg8: memref<128x256xbf16, #tpu.memory_space<vmem>>, %arg9: memref<1x256xf32, #tpu.memory_space<vmem>>, %arg10: memref<128x1xbf16, #tpu.memory_space<vmem>>, %arg11: memref<128x128xbf16, #tpu.memory_space<vmem>>, %arg12: memref<1x128xf32, #tpu.memory_space<vmem>>, %arg13: memref<128x128xbf16, #tpu.memory_space<vmem>>, %arg14: memref<1x128xf32, #tpu.memory_space<vmem>>, %arg15: memref<2x128xf32, #tpu.memory_space<vmem>>) attributes {dimension_semantics = [#tpu.dimension_semantics<parallel>], iteration_bounds = array<i64: 1>, scalar_prefetch = 0 : i64, scratch_operands = 0 : i64, tpu.core_type = #tpu.core_type<tc>, window_params = [{transform_indices = @transform_0, window_bounds = array<i64: 2, 8, 128>}, {pipeline_mode = #tpu.pipeline_mode<synchronous>, transform_indices = @transform_1, window_bounds = array<i64: 128, 128>}, {pipeline_mode = #tpu.pipeline_mode<synchronous>, transform_indices = @transform_2, window_bounds = array<i64: 1, 128>}, {pipeline_mode = #tpu.pipeline_mode<synchronous>, transform_indices = @transform_3, window_bounds = array<i64: 128, 128>}, {pipeline_mode = #tpu.pipeline_mode<synchronous>, transform_indices = @transform_4, window_bounds = array<i64: 1, 128>}, {pipeline_mode = #tpu.pipeline_mode<synchronous>, transform_indices = @transform_5, window_bounds = array<i64: 128, 128>}, {pipeline_mode = #tpu.pipeline_mode<synchronous>, transform_indices = @transform_6, window_bounds = array<i64: 1, 128>}, {pipeline_mode = #tpu.pipeline_mode<synchronous>, transform_indices = @transform_7, window_bounds = array<i64: 128, 256>}, {pipeline_mode = #tpu.pipeline_mode<synchronous>, transform_indices = @transform_8, window_bounds = array<i64: 1, 256>}, {pipeline_mode = #tpu.pipeline_mode<synchronous>, transform_indices = @transform_9, window_bounds = array<i64: 128, 1>}, {pipeline_mode = #tpu.pipeline_mode<synchronous>, transform_indices = @transform_10, window_bounds = array<i64: 128, 128>}, {pipeline_mode = #tpu.pipeline_mode<synchronous>, transform_indices = @transform_11, window_bounds = array<i64: 1, 128>}, {pipeline_mode = #tpu.pipeline_mode<synchronous>, transform_indices = @transform_12, window_bounds = array<i64: 128, 128>}, {pipeline_mode = #tpu.pipeline_mode<synchronous>, transform_indices = @transform_13, window_bounds = array<i64: 1, 128>}, {transform_indices = @transform_14, window_bounds = array<i64: 2, 128>}]} {
    %c0 = arith.constant 0 : index
    %c0_0 = arith.constant 0 : index
    %c0_1 = arith.constant 0 : index
    %0 = vector.load %arg1[%c0, %c0_0, %c0_1] : memref<2x8x128xbf16, #tpu.memory_space<vmem>>, vector<2x8x128xbf16>
    %1 = vector.shape_cast %0 : vector<2x8x128xbf16> to vector<16x128xbf16>
    %c0_2 = arith.constant 0 : index
    %c0_3 = arith.constant 0 : index
    %2 = vector.load %arg2[%c0_2, %c0_3] : memref<128x128xbf16, #tpu.memory_space<vmem>>, vector<128x128xbf16>
    %cst = arith.constant dense<0.000000e+00> : vector<16x128xf32>
    %3 = tpu.matmul %1, %2, %cst {dimension_numbers = #tpu.dot_dimension_numbers<[1], [0], [0], [1], [0, 0, 1, 1], [], []>} : vector<16x128xbf16>, vector<128x128xbf16>, vector<16x128xf32> -> vector<16x128xf32>
    %c0_4 = arith.constant 0 : index
    %c0_5 = arith.constant 0 : index
    %4 = vector.load %arg3[%c0_4, %c0_5] : memref<1x128xf32, #tpu.memory_space<vmem>>, vector<1x128xf32>
    %5 = vector.broadcast %4 : vector<1x128xf32> to vector<16x128xf32>
    %6 = arith.addf %3, %5 : vector<16x128xf32>
    %7 = arith.truncf %6 : vector<16x128xf32> to vector<16x128xbf16>
    %c0_6 = arith.constant 0 : index
    %c0_7 = arith.constant 0 : index
    %8 = vector.load %arg4[%c0_6, %c0_7] : memref<128x128xbf16, #tpu.memory_space<vmem>>, vector<128x128xbf16>
    %cst_8 = arith.constant dense<0.000000e+00> : vector<16x128xf32>
    %9 = tpu.matmul %7, %8, %cst_8 {dimension_numbers = #tpu.dot_dimension_numbers<[1], [0], [0], [1], [0, 0, 1, 1], [], []>} : vector<16x128xbf16>, vector<128x128xbf16>, vector<16x128xf32> -> vector<16x128xf32>
    %c0_9 = arith.constant 0 : index
    %c0_10 = arith.constant 0 : index
    %10 = vector.load %arg5[%c0_9, %c0_10] : memref<1x128xf32, #tpu.memory_space<vmem>>, vector<1x128xf32>
    %11 = vector.broadcast %10 : vector<1x128xf32> to vector<16x128xf32>
    %12 = arith.addf %9, %11 : vector<16x128xf32>
    %cst_11 = arith.constant 0.000000e+00 : f32
    %13 = vector.broadcast %cst_11 : f32 to vector<16x128xf32>
    %14 = arith.maximumf %12, %13 : vector<16x128xf32>
    %15 = arith.truncf %14 : vector<16x128xf32> to vector<16x128xbf16>
    %c0_12 = arith.constant 0 : index
    %c0_13 = arith.constant 0 : index
    %16 = vector.load %arg6[%c0_12, %c0_13] : memref<128x128xbf16, #tpu.memory_space<vmem>>, vector<128x128xbf16>
    %cst_14 = arith.constant dense<0.000000e+00> : vector<16x128xf32>
    %17 = tpu.matmul %15, %16, %cst_14 {dimension_numbers = #tpu.dot_dimension_numbers<[1], [0], [0], [1], [0, 0, 1, 1], [], []>} : vector<16x128xbf16>, vector<128x128xbf16>, vector<16x128xf32> -> vector<16x128xf32>
    %c0_15 = arith.constant 0 : index
    %c0_16 = arith.constant 0 : index
    %18 = vector.load %arg7[%c0_15, %c0_16] : memref<1x128xf32, #tpu.memory_space<vmem>>, vector<1x128xf32>
    %19 = vector.broadcast %18 : vector<1x128xf32> to vector<16x128xf32>
    %20 = arith.addf %17, %19 : vector<16x128xf32>
    %21 = arith.truncf %20 : vector<16x128xf32> to vector<16x128xbf16>
    %c0_17 = arith.constant 0 : index
    %c0_18 = arith.constant 0 : index
    %22 = vector.load %arg8[%c0_17, %c0_18] : memref<128x256xbf16, #tpu.memory_space<vmem>>, vector<128x256xbf16>
    %cst_19 = arith.constant dense<0.000000e+00> : vector<16x256xf32>
    %23 = tpu.matmul %21, %22, %cst_19 {dimension_numbers = #tpu.dot_dimension_numbers<[1], [0], [0], [1], [0, 0, 1, 1], [], []>} : vector<16x128xbf16>, vector<128x256xbf16>, vector<16x256xf32> -> vector<16x256xf32>
    %c0_20 = arith.constant 0 : index
    %c0_21 = arith.constant 0 : index
    %24 = vector.load %arg9[%c0_20, %c0_21] : memref<1x256xf32, #tpu.memory_space<vmem>>, vector<1x256xf32>
    %25 = vector.broadcast %24 : vector<1x256xf32> to vector<16x256xf32>
    %26 = arith.addf %23, %25 : vector<16x256xf32>
    %27 = vector.extract_strided_slice %26 {offsets = [0, 0], sizes = [16, 128], strides = [1, 1]} : vector<16x256xf32> to vector<16x128xf32>
    %28 = math.tanh %27 : vector<16x128xf32>
    %29 = vector.extract_strided_slice %26 {offsets = [0, 128], sizes = [16, 128], strides = [1, 1]} : vector<16x256xf32> to vector<16x128xf32>
    %30 = arith.negf %29 : vector<16x128xf32>
    %31 = math.exp %30 : vector<16x128xf32>
    %cst_22 = arith.constant 1.000000e+00 : f32
    %32 = vector.broadcast %cst_22 : f32 to vector<16x128xf32>
    %33 = arith.addf %32, %31 : vector<16x128xf32>
    %34 = arith.divf %32, %33 : vector<16x128xf32>
    %35 = arith.mulf %28, %34 : vector<16x128xf32>
    %36 = arith.truncf %35 : vector<16x128xf32> to vector<16x128xbf16>
    %c0_23 = arith.constant 0 : index
    %c0_24 = arith.constant 0 : index
    %37 = vector.load %arg10[%c0_23, %c0_24] : memref<128x1xbf16, #tpu.memory_space<vmem>>, vector<128x1xbf16>
    %cst_25 = arith.constant dense<0.000000e+00> : vector<16x1xf32>
    %38 = tpu.matmul %36, %37, %cst_25 {dimension_numbers = #tpu.dot_dimension_numbers<[1], [0], [0], [1], [0, 0, 1, 1], [], []>} : vector<16x128xbf16>, vector<128x1xbf16>, vector<16x1xf32> -> vector<16x1xf32>
    %39 = vector.shape_cast %38 : vector<16x1xf32> to vector<2x8x1xf32>
    %cst_26 = arith.constant dense<0xFF800000> : vector<2x1xf32>
    %40 = vector.multi_reduction <maximumf>, %39, %cst_26 [1] : vector<2x8x1xf32> to vector<2x1xf32>
    %41 = vector.shape_cast %40 : vector<2x1xf32> to vector<2x1x1xf32>
    %42 = vector.broadcast %41 : vector<2x1x1xf32> to vector<2x8x1xf32>
    %43 = arith.subf %39, %42 : vector<2x8x1xf32>
    %44 = math.exp %43 : vector<2x8x1xf32>
    %cst_27 = arith.constant dense<0.000000e+00> : vector<2x1xf32>
    %45 = vector.multi_reduction <add>, %44, %cst_27 [1] : vector<2x8x1xf32> to vector<2x1xf32>
    %46 = vector.shape_cast %45 : vector<2x1xf32> to vector<2x1x1xf32>
    %47 = tpu.reciprocal %46 {approx = true} : vector<2x1x1xf32> -> vector<2x1x1xf32>
    %48 = vector.broadcast %47 : vector<2x1x1xf32> to vector<2x8x1xf32>
    %49 = arith.mulf %44, %48 : vector<2x8x1xf32>
    %50 = vector.shape_cast %21 : vector<16x128xbf16> to vector<2x8x128xbf16>
    %51 = arith.extf %50 : vector<2x8x128xbf16> to vector<2x8x128xf32>
    %52 = vector.broadcast %49 : vector<2x8x1xf32> to vector<2x8x128xf32>
    %53 = arith.mulf %52, %51 : vector<2x8x128xf32>
    %cst_28 = arith.constant dense<0.000000e+00> : vector<2x128xf32>
    %54 = vector.multi_reduction <add>, %53, %cst_28 [1] : vector<2x8x128xf32> to vector<2x128xf32>
    %55 = arith.truncf %54 : vector<2x128xf32> to vector<2x128xbf16>
    %c0_29 = arith.constant 0 : index
    %c0_30 = arith.constant 0 : index
    %56 = vector.load %arg11[%c0_29, %c0_30] : memref<128x128xbf16, #tpu.memory_space<vmem>>, vector<128x128xbf16>
    %cst_31 = arith.constant dense<0.000000e+00> : vector<2x128xf32>
    %57 = tpu.matmul %55, %56, %cst_31 {dimension_numbers = #tpu.dot_dimension_numbers<[1], [0], [0], [1], [0, 0, 1, 1], [], []>} : vector<2x128xbf16>, vector<128x128xbf16>, vector<2x128xf32> -> vector<2x128xf32>
    %c0_32 = arith.constant 0 : index
    %c0_33 = arith.constant 0 : index
    %58 = vector.load %arg12[%c0_32, %c0_33] : memref<1x128xf32, #tpu.memory_space<vmem>>, vector<1x128xf32>
    %59 = vector.broadcast %58 : vector<1x128xf32> to vector<2x128xf32>
    %60 = arith.addf %57, %59 : vector<2x128xf32>
    %cst_34 = arith.constant 0.000000e+00 : f32
    %61 = vector.broadcast %cst_34 : f32 to vector<2x128xf32>
    %62 = arith.maximumf %60, %61 : vector<2x128xf32>
    %63 = arith.truncf %62 : vector<2x128xf32> to vector<2x128xbf16>
    %c0_35 = arith.constant 0 : index
    %c0_36 = arith.constant 0 : index
    %64 = vector.load %arg13[%c0_35, %c0_36] : memref<128x128xbf16, #tpu.memory_space<vmem>>, vector<128x128xbf16>
    %cst_37 = arith.constant dense<0.000000e+00> : vector<2x128xf32>
    %65 = tpu.matmul %63, %64, %cst_37 {dimension_numbers = #tpu.dot_dimension_numbers<[1], [0], [0], [1], [0, 0, 1, 1], [], []>} : vector<2x128xbf16>, vector<128x128xbf16>, vector<2x128xf32> -> vector<2x128xf32>
    %c0_38 = arith.constant 0 : index
    %c0_39 = arith.constant 0 : index
    %66 = vector.load %arg14[%c0_38, %c0_39] : memref<1x128xf32, #tpu.memory_space<vmem>>, vector<1x128xf32>
    %67 = vector.broadcast %66 : vector<1x128xf32> to vector<2x128xf32>
    %68 = arith.addf %65, %67 : vector<2x128xf32>
    %c0_40 = arith.constant 0 : index
    %c0_41 = arith.constant 0 : index
    %69 = vector.load %arg15[%c0_40, %c0_41] : memref<2x128xf32, #tpu.memory_space<vmem>>, vector<2x128xf32>
    tpu.vector_store %arg15[%c0_40, %c0_41], %68 {strides = array<i32>} : memref<2x128xf32, #tpu.memory_space<vmem>>, vector<2x128xf32>,
    return
  }
  func.func @transform_0(%arg0: i32) -> (i32, i32, i32) {
    %c0_i32 = arith.constant 0 : i32
    %c0_i32_0 = arith.constant 0 : i32
    %c0_i32_1 = arith.constant 0 : i32
    return %arg0, %c0_i32, %c0_i32_0 : i32, i32, i32
  }
  func.func @transform_1(%arg0: i32) -> (i32, i32) {
    %c0_i32 = arith.constant 0 : i32
    %c0_i32_0 = arith.constant 0 : i32
    %c0_i32_1 = arith.constant 0 : i32
    return %c0_i32, %c0_i32_0 : i32, i32
  }
  func.func @transform_2(%arg0: i32) -> (i32, i32) {
    %c0_i32 = arith.constant 0 : i32
    %c0_i32_0 = arith.constant 0 : i32
    %c0_i32_1 = arith.constant 0 : i32
    return %c0_i32, %c0_i32_0 : i32, i32
  }
  func.func @transform_3(%arg0: i32) -> (i32, i32) {
    %c0_i32 = arith.constant 0 : i32
    %c0_i32_0 = arith.constant 0 : i32
    %c0_i32_1 = arith.constant 0 : i32
    return %c0_i32, %c0_i32_0 : i32, i32
  }
  func.func @transform_4(%arg0: i32) -> (i32, i32) {
    %c0_i32 = arith.constant 0 : i32
    %c0_i32_0 = arith.constant 0 : i32
    %c0_i32_1 = arith.constant 0 : i32
    return %c0_i32, %c0_i32_0 : i32, i32
  }
  func.func @transform_5(%arg0: i32) -> (i32, i32) {
    %c0_i32 = arith.constant 0 : i32
    %c0_i32_0 = arith.constant 0 : i32
    %c0_i32_1 = arith.constant 0 : i32
    return %c0_i32, %c0_i32_0 : i32, i32
  }
  func.func @transform_6(%arg0: i32) -> (i32, i32) {
    %c0_i32 = arith.constant 0 : i32
    %c0_i32_0 = arith.constant 0 : i32
    %c0_i32_1 = arith.constant 0 : i32
    return %c0_i32, %c0_i32_0 : i32, i32
  }
  func.func @transform_7(%arg0: i32) -> (i32, i32) {
    %c0_i32 = arith.constant 0 : i32
    %c0_i32_0 = arith.constant 0 : i32
    %c0_i32_1 = arith.constant 0 : i32
    return %c0_i32, %c0_i32_0 : i32, i32
  }
  func.func @transform_8(%arg0: i32) -> (i32, i32) {
    %c0_i32 = arith.constant 0 : i32
    %c0_i32_0 = arith.constant 0 : i32
    %c0_i32_1 = arith.constant 0 : i32
    return %c0_i32, %c0_i32_0 : i32, i32
  }
  func.func @transform_9(%arg0: i32) -> (i32, i32) {
    %c0_i32 = arith.constant 0 : i32
    %c0_i32_0 = arith.constant 0 : i32
    %c0_i32_1 = arith.constant 0 : i32
    return %c0_i32, %c0_i32_0 : i32, i32
  }
  func.func @transform_10(%arg0: i32) -> (i32, i32) {
    %c0_i32 = arith.constant 0 : i32
    %c0_i32_0 = arith.constant 0 : i32
    %c0_i32_1 = arith.constant 0 : i32
    return %c0_i32, %c0_i32_0 : i32, i32
  }
  func.func @transform_11(%arg0: i32) -> (i32, i32) {
    %c0_i32 = arith.constant 0 : i32
    %c0_i32_0 = arith.constant 0 : i32
    %c0_i32_1 = arith.constant 0 : i32
    return %c0_i32, %c0_i32_0 : i32, i32
  }
  func.func @transform_12(%arg0: i32) -> (i32, i32) {
    %c0_i32 = arith.constant 0 : i32
    %c0_i32_0 = arith.constant 0 : i32
    %c0_i32_1 = arith.constant 0 : i32
    return %c0_i32, %c0_i32_0 : i32, i32
  }
  func.func @transform_13(%arg0: i32) -> (i32, i32) {
    %c0_i32 = arith.constant 0 : i32
    %c0_i32_0 = arith.constant 0 : i32
    %c0_i32_1 = arith.constant 0 : i32
    return %c0_i32, %c0_i32_0 : i32, i32
  }
  func.func @transform_14(%arg0: i32) -> (i32, i32) {
    %c0_i32 = arith.constant 0 : i32
    %c0_i32_0 = arith.constant 0 : i32
    return %arg0, %c0_i32 : i32, i32
  }
}

</mosaic_0001>

<bundles_post_ra>
// kernel: tpu_custom_call.1
= control target key start
LH: loop header
LB: loop body
LE: loop exit
PB: predicated region body
PF: predicated region fallthrough
CT: control target
= control target key end

     0   :  { %19 = vsyncpa [#allocation3], 0  ;;  %s1949_s0 = inlined_call_operand.hbm [shape: bf16[2,8,128], index: 0, kind: input, shape index: {}]   ;;  %s1950_s1 = inlined_call_operand.vmem [shape: bf16[128,128], index: 1, kind: input, shape index: {}]   ;;  %s1951_s2 = inlined_call_operand.vmem [shape: f32[1,128], index: 2, kind: input, shape index: {}]   ;;  %s1952_s3 = inlined_call_operand.hbm [shape: bf16[128,128], index: 3, kind: input, shape index: {}]   ;;  %s1953_s4 = inlined_call_operand.vmem [shape: f32[1,128], index: 4, kind: input, shape index: {}]   ;;  %s1954_s5 = inlined_call_operand.hbm [shape: bf16[128,128], index: 5, kind: input, shape index: {}]   ;;  %s1955_s6 = inlined_call_operand.vmem [shape: f32[1,128], index: 6, kind: input, shape index: {}]   ;;  %s1956_s7 = inlined_call_operand.hbm [shape: bf16[128,256], index: 7, kind: input, shape index: {}]   ;;  %s1957_s8 = inlined_call_operand.vmem [shape: f32[1,256], index: 8, kind: input, shape index: {}]   ;;  %s1958_s9 = inlined_call_operand.vmem [shape: bf16[128,1], index: 9, kind: input, shape index: {}]   ;;  %s1959_s10 = inlined_call_operand.hbm [shape: bf16[128,128], index: 10, kind: input, shape index: {}]   ;;  %s1960_s11 = inlined_call_operand.vmem [shape: f32[1,128], index: 11, kind: input, shape index: {}]   ;;  %s1961_s12 = inlined_call_operand.hbm [shape: bf16[128,128], index: 12, kind: input, shape index: {}]   ;;  %s1962_s13 = inlined_call_operand.vmem [shape: f32[1,128], index: 13, kind: input, shape index: {}]   ;;  %s1963_s14 = inlined_call_operand.hbm [shape: f32[2,128], index: 14, kind: output, shape index: {}]  }
   0x1   :  { %20 = vsyncpa [#allocation6], 0 }
   0x2   :  { %21 = vsyncpa [#allocation9], 0 }
   0x3   :  { %22 = vsyncpa [#allocation12], 0 }
   0x4   :  { %23 = vsyncpa [#allocation4], 0  ;;  %s1600_s29 = smov [#allocation5]   ;;  %s1601_s15 = smov [#allocation8]  }
   0x5   :  { %s45_s30 = sshll.u32 %s1600_s29, 4  ;;  %s73_s16 = sshll.u32 %s1601_s15, 4  ;;  %s46_s30 = int_to_ptr.vmem [resolvable:$true] %s45_s30  ;;  %s1689_s16 = int_to_ptr.vmem [resolvable:$true] %s73_s16 }
   0x6   :  { %s1436_s19 = scalar_lea.hbm %s1952_s3, 1024 }
   0x7   :  { %p1437_p0 = scmp.ne.s32.totalorder %s1952_s3, %s1436_s19  ;;  %p1440_p1 = scmp.lt.u32.totalorder %s1436_s19, %s1952_s3 }
   0x9   :  { %p1442_p2 = pnand %p1440_p1, %p1437_p0 }
   0xb   :  { %1445 = shalt.err (!%p1442_p2)
}
   0xc   :  { %s1446_s24 = scalar_lea.vmem %s46_s30, 1024  ;;  %p1451_p4 = scmp.lt.s32.totalorder %s46_s30, %s46_s30 }
   0xd   :  { %p1447_p3 = scmp.ne.s32.totalorder %s46_s30, %s1446_s24  ;;  %p1452_p5 = scmp.lt.s32.totalorder %s1446_s24, %s1446_s24 }
   0xf   :  { %p1453_p6 = por %p1452_p5, %p1451_p4 }
  0x11   :  { %p1454_p7 = pnand %p1453_p6, %p1447_p3 }
  0x13   :  { %1457 = shalt.err (!%p1454_p7)
}
  0x14   :  { %s1964_s25 = smov 64   ;;  %s1603_s26 = smov 4  }
  0x15   :  { %51 = dma.hbm_to_vmem [thread:$0]  %s1952_s3, 1024, %s46_s30, [#allocation6], %s1964_s25, %s1964_s25, %s1603_s26  }
  0x16   :  { %s1458_s17 = scalar_lea.hbm %s1956_s7, 2048 }
  0x17   :  { %p1459_p8 = scmp.ne.s32.totalorder %s1956_s7, %s1458_s17  ;;  %p1462_p9 = scmp.lt.u32.totalorder %s1458_s17, %s1956_s7 }
  0x19   :  { %p1464_p10 = pnand %p1462_p9, %p1459_p8 }
  0x1b   :  { %1467 = shalt.err (!%p1464_p10)
}
  0x1c   :  { %s1468_s22 = scalar_lea.vmem %s1689_s16, 2048  ;;  %p1473_p12 = scmp.lt.s32.totalorder %s1689_s16, %s1689_s16 }
  0x1d   :  { %p1469_p11 = scmp.ne.s32.totalorder %s1689_s16, %s1468_s22  ;;  %p1474_p13 = scmp.lt.s32.totalorder %s1468_s22, %s1468_s22 }
  0x1f   :  { %p1475_p0 = por %p1474_p13, %p1473_p12 }
  0x21   :  { %p1476_p1 = pnand %p1475_p0, %p1469_p11 }
  0x23   :  { %1479 = shalt.err (!%p1476_p1)
}
  0x24   :  { %s1604_s3 = smov 128   ;;  %s1605_s30 = smov 8  }
  0x25   :  { %79 = dma.hbm_to_vmem [thread:$0]  %s1956_s7, 2048, %s1689_s16, [#allocation9], %s1604_s3, %s1604_s3, %s1605_s30  }
  0x26   :  { %s1606_s27 = smov [#allocation2]   ;;  %s1607_s29 = smov [#allocation7]  }
  0x27   :  { %s29_s28 = sshll.u32 %s1606_s27, 4  ;;  %s59_s15 = sshll.u32 %s1607_s29, 4  ;;  %s30_s28 = int_to_ptr.vmem [resolvable:$true] %s29_s28  ;;  %s1723_s15 = int_to_ptr.vmem [resolvable:$true] %s59_s15 }
  0x28   :  { %s1480_s19 = scalar_lea.hbm %s1949_s0, 128 }
  0x29   :  { %p1481_p2 = scmp.ne.s32.totalorder %s1949_s0, %s1480_s19  ;;  %p1484_p3 = scmp.lt.u32.totalorder %s1480_s19, %s1949_s0 }
  0x2b   :  { %p1486_p4 = pnand %p1484_p3, %p1481_p2 }
  0x2d   :  { %1489 = shalt.err (!%p1486_p4)
}
  0x2e   :  { %s1490_s7 = scalar_lea.vmem %s30_s28, 128  ;;  %p1495_p6 = scmp.lt.s32.totalorder %s30_s28, %s30_s28 }
  0x2f   :  { %p1491_p5 = scmp.ne.s32.totalorder %s30_s28, %s1490_s7  ;;  %p1496_p7 = scmp.lt.s32.totalorder %s1490_s7, %s1490_s7 }
  0x31   :  { %p1497_p8 = por %p1496_p7, %p1495_p6 }
  0x33   :  { %p1498_p9 = pnand %p1497_p8, %p1491_p5 }
  0x35   :  { %1501 = shalt.err (!%p1498_p9)
}
  0x36   :  { %s1966_s16 = smov 64   ;;  %s1502_s25 = scalar_lea.hbm %s1954_s5, 1024 }
  0x37   :  { %35 = dma.hbm_to_vmem [thread:$0]  %s1949_s0, 128, %s30_s28, [#allocation3], %s1966_s16, %s1966_s16, %s1603_s26  }
  0x38   :  { %p1503_p10 = scmp.ne.s32.totalorder %s1954_s5, %s1502_s25  ;;  %p1506_p11 = scmp.lt.u32.totalorder %s1502_s25, %s1954_s5 }
  0x3a   :  { %p1508_p12 = pnand %p1506_p11, %p1503_p10 }
  0x3c   :  { %1511 = shalt.err (!%p1508_p12)
}
  0x3d   :  { %s1512_s19 = scalar_lea.vmem %s1723_s15, 1024  ;;  %p1517_p0 = scmp.lt.s32.totalorder %s1723_s15, %s1723_s15 }
  0x3e   :  { %p1513_p13 = scmp.ne.s32.totalorder %s1723_s15, %s1512_s19  ;;  %p1518_p1 = scmp.lt.s32.totalorder %s1512_s19, %s1512_s19 }
  0x40   :  { %p1519_p2 = por %p1518_p1, %p1517_p0 }
  0x42   :  { %p1520_p3 = pnand %p1519_p2, %p1513_p13 }
  0x44   :  { %1523 = shalt.err (!%p1520_p3)
}
  0x45   :  { %65 = dma.hbm_to_vmem [thread:$0]  %s1954_s5, 1024, %s1723_s15, [#allocation6], %s1966_s16, %s1966_s16, %s1603_s26  }
  0x46   :  { %s1608_s20 = smov [#allocation10]   ;;  %s1609_s22 = smov [#allocation11]  }
  0x47   :  { %s89_s21 = sshll.u32 %s1608_s20, 4  ;;  %s103_s7 = sshll.u32 %s1609_s22, 4  ;;  %s90_s21 = int_to_ptr.vmem [resolvable:$true] %s89_s21  ;;  %s1760_s7 = int_to_ptr.vmem [resolvable:$true] %s103_s7 }
  0x48   :  { %s1524_s23 = scalar_lea.hbm %s1959_s10, 1024 }
  0x49   :  { %p1525_p4 = scmp.ne.s32.totalorder %s1959_s10, %s1524_s23  ;;  %p1528_p5 = scmp.lt.u32.totalorder %s1524_s23, %s1959_s10 }
  0x4b   :  { %p1530_p6 = pnand %p1528_p5, %p1525_p4 }
  0x4d   :  { %1533 = shalt.err (!%p1530_p6)
}
  0x4e   :  { %s1534_s5 = scalar_lea.vmem %s90_s21, 1024  ;;  %p1539_p8 = scmp.lt.s32.totalorder %s90_s21, %s90_s21 }
  0x4f   :  { %p1535_p7 = scmp.ne.s32.totalorder %s90_s21, %s1534_s5  ;;  %p1540_p9 = scmp.lt.s32.totalorder %s1534_s5, %s1534_s5 }
  0x51   :  { %p1541_p10 = por %p1540_p9, %p1539_p8 }
  0x53   :  { %p1542_p11 = pnand %p1541_p10, %p1535_p7 }
  0x55   :  { %1545 = shalt.err (!%p1542_p11)
}
  0x56   :  { %95 = dma.hbm_to_vmem [thread:$0]  %s1959_s10, 1024, %s90_s21, [#allocation9], %s1966_s16, %s1966_s16, %s1603_s26  }
  0x57   :  { %s1546_s0 = scalar_lea.hbm %s1961_s12, 1024 }
  0x58   :  { %p1547_p12 = scmp.ne.s32.totalorder %s1961_s12, %s1546_s0  ;;  %p1550_p13 = scmp.lt.u32.totalorder %s1546_s0, %s1961_s12 }
  0x5a   :  { %p1552_p0 = pnand %p1550_p13, %p1547_p12 }
  0x5c   :  { %1555 = shalt.err (!%p1552_p0)
}
  0x5d   :  { %s1556_s30 = scalar_lea.vmem %s1760_s7, 1024  ;;  %p1561_p2 = scmp.lt.s32.totalorder %s1760_s7, %s1760_s7 }
  0x5e   :  { %p1557_p1 = scmp.ne.s32.totalorder %s1760_s7, %s1556_s30  ;;  %p1562_p3 = scmp.lt.s32.totalorder %s1556_s30, %s1556_s30 }
  0x60   :  { %p1563_p4 = por %p1562_p3, %p1561_p2 }
  0x62   :  { %p1564_p5 = pnand %p1563_p4, %p1557_p1 }
  0x64   :  { %1567 = shalt.err (!%p1564_p5)
}
  0x65   :  { %109 = dma.hbm_to_vmem [thread:$0]  %s1961_s12, 1024, %s1760_s7, [#allocation12], %s1966_s16, %s1966_s16, %s1603_s26  }
  0x66   :  { %1590 = dma.done.wait [#allocation3], 128  }
  0x67   :  { %1591 = vsyncadd [#allocation3], 4294967168 }
  0x68   :  { %1592 = dma.done.wait [#allocation6], 2048  }
  0x69   :  { %1593 = vsyncadd [#allocation6], 4294965248 }
  0x6a   :  { %1594 = dma.done.wait [#allocation9], 3072  }
  0x6b   :  { %1595 = vsyncadd [#allocation9], 4294964224 }
  0x6c   :  { %1596 = dma.done.wait [#allocation12], 1024  }
  0x6d   :  { %1597 = vsyncadd [#allocation12], 4294966272  ;;  %v1610_v0 = vmov 0.0   ;;  %vm1611_vm0 = vmmov 0   ;;  %v1343_v1 = vld [vmem:[%s1950_s1] sm:$0xff]   ;;  %v1344_v2 = vld [vmem:[%s1950_s1 + $0x8] sm:$0xff]  }
  0x6e   :  { %1208 = vmatprep.subr.bf16.mxu0 %v1610_v0  ;;  %1224 = vmatprep.mubr.msk.bf16.mxu0 %vm1611_vm0, %v1610_v0  ;;  %v1345_v3 = vld [vmem:[%s1950_s1 + $0x10] sm:$0xff]   ;;  %v1352_v4 = vld [vmem:[#allocation5] sm:$0xff]   ;;  %v1346_v5 = vld [vmem:[%s1950_s1 + $0x18] sm:$0xff]   ;;  %v1612_v60 = vmov 0   ;;  %vm753_vm1 = vcmask 7168   ;;  %vm854_vm2 = vcmask 1041409  }
  0x6f   :  { %1228 = vmatprep.subr.bf16.mxu1 %v1610_v0  ;;  %1244 = vmatprep.mubr.msk.bf16.mxu1 %vm1611_vm0, %v1610_v0  ;;  %v1353_v6 = vld [vmem:[#allocation5 + $0x8] sm:$0xff]   ;;  %v1347_v7 = vld [vmem:[%s1950_s1 + $0x20] sm:$0xff]   ;;  %v1354_v8 = vld [vmem:[#allocation5 + $0x10] sm:$0xff]  }
  0x70   :  { %1209 = vmatpush3.bf16.msra.mxu0 %v1343_v1  ;;  %1229 = vmatpush3.bf16.msra.mxu1 %v1352_v4  ;;  %v1348_v9 = vld [vmem:[%s1950_s1 + $0x28] sm:$0xff]   ;;  %v1355_v10 = vld [vmem:[#allocation5 + $0x18] sm:$0xff]   ;;  %v1349_v11 = vld [vmem:[%s1950_s1 + $0x30] sm:$0xff]  }
  0x71   :  { %1210 = vmatprep.subr.bf16.mxu0 %v1610_v0  ;;  %1230 = vmatprep.subr.bf16.mxu1 %v1610_v0  ;;  %v1356_v12 = vld [vmem:[#allocation5 + $0x20] sm:$0xff]   ;;  %v1350_v13 = vld [vmem:[%s1950_s1 + $0x38] sm:$0xff]   ;;  %v1357_v14 = vld [vmem:[#allocation5 + $0x28] sm:$0xff]   ;;  %s1613_s1 = smov [#allocation13]  }
  0x72   :  { %v1351_v15 = vld [vmem:[#allocation2] sm:$0xff]   ;;  %v1358_v16 = vld [vmem:[#allocation5 + $0x30] sm:$0xff]   ;;  %v1360_v18 = vld [vmem:[#allocation7] sm:$0xff]   ;;  %1342 = vset.pattern.permute.xlu0 %v1612_v60  ;;  %s1066_s20 = sshll.u32 %s1613_s1, 4  ;;  %s1067_s20 = int_to_ptr.vmem [resolvable:$true] %s1066_s20 }
  0x73   :  { %v1359_v17 = vld [vmem:[#allocation5 + $0x38] sm:$0xff]   ;;  %v1361_v19 = vld [vmem:[#allocation7 + $0x8] sm:$0xff]   ;;  %v1362_v20 = vld [vmem:[#allocation7 + $0x10] sm:$0xff]   ;;  %p1573_p7 = scmp.lt.s32.totalorder %s1067_s20, %s1067_s20 }
  0x74   :  { %1211 = vmatpush3.bf16.msra.mxu0 %v1344_v2  ;;  %1231 = vmatpush3.bf16.msra.mxu1 %v1353_v6  ;;  %v1363_v21 = vld [vmem:[#allocation7 + $0x18] sm:$0xff]   ;;  %v1364_v22 = vld [vmem:[#allocation7 + $0x20] sm:$0xff]   ;;  %v1365_v23 = vld [vmem:[#allocation7 + $0x28] sm:$0xff]  }
  0x75   :  { %1212 = vmatprep.subr.bf16.mxu0 %v1610_v0  ;;  %1232 = vmatprep.subr.bf16.mxu1 %v1610_v0  ;;  %v1078_v24 = vld [vmem:[%s1951_s2] ss:$0 sm:$0xff]  ;;  %v1366_v32 = vld [vmem:[#allocation7 + $0x30] sm:$0xff]   ;;  %v1368_v34 = vld [vmem:[#allocation8] ss:$8 sps:$4 sm:$0xff]  }
  0x76   :  { %v1367_v33 = vld [vmem:[#allocation7 + $0x38] sm:$0xff]   ;;  %v1370_v35 = vld [vmem:[#allocation8 + $0x4] ss:$8 sps:$4 sm:$0xff]   ;;  %v1374_v39 = vld [vmem:[#allocation8 + $0x20] ss:$8 sps:$4 sm:$0xff]  }
  0x77   :  { %v1373_v36 = vld [vmem:[#allocation8 + $0x14] ss:$8 sps:$4 sm:$0xff]   ;;  %v1371_v37 = vld [vmem:[#allocation8 + $0x10] ss:$8 sps:$4 sm:$0xff]   ;;  %v1376_v38 = vld [vmem:[#allocation8 + $0x24] ss:$8 sps:$4 sm:$0xff]  }
  0x78   :  { %1213 = vmatpush3.bf16.msra.mxu0 %v1345_v3  ;;  %1233 = vmatpush3.bf16.msra.mxu1 %v1354_v8  ;;  %v1379_v40 = vld [vmem:[#allocation8 + $0x34] ss:$8 sps:$4 sm:$0xff]   ;;  %v1377_v41 = vld [vmem:[#allocation8 + $0x30] ss:$8 sps:$4 sm:$0xff]   ;;  %v1382_v42 = vld [vmem:[#allocation8 + $0x44] ss:$8 sps:$4 sm:$0xff]  }
  0x79   :  { %1214 = vmatprep.subr.bf16.mxu0 %v1610_v0  ;;  %1234 = vmatprep.subr.bf16.mxu1 %v1610_v0  ;;  %v1380_v43 = vld [vmem:[#allocation8 + $0x40] ss:$8 sps:$4 sm:$0xff]   ;;  %v1385_v44 = vld [vmem:[#allocation8 + $0x54] ss:$8 sps:$4 sm:$0xff]   ;;  %v1383_v45 = vld [vmem:[#allocation8 + $0x50] ss:$8 sps:$4 sm:$0xff]  }
  0x7a   :  { %v1388_v46 = vld [vmem:[#allocation8 + $0x64] ss:$8 sps:$4 sm:$0xff]   ;;  %v1386_v47 = vld [vmem:[#allocation8 + $0x60] ss:$8 sps:$4 sm:$0xff]   ;;  %v1088_v48 = vld [vmem:[%s1953_s4] ss:$0 sm:$0xff] }
  0x7b   :  { %v1391_v58 = vld [vmem:[#allocation8 + $0x74] ss:$8 sps:$4 sm:$0xff]   ;;  %v1389_v59 = vld [vmem:[#allocation8 + $0x70] ss:$8 sps:$4 sm:$0xff]   ;;  %v1394_v8 = vld [vmem:[%s1958_s9 + $0x10] sm:$0xff]  }
  0x7c   :  { %1215 = vmatpush3.bf16.msra.mxu0 %v1346_v5  ;;  %1235 = vmatpush3.bf16.msra.mxu1 %v1355_v10  ;;  %v1097_v61 = vld [vmem:[%s1955_s6] ss:$0 sm:$0xff] }
  0x7d   :  { %1216 = vmatprep.subr.bf16.mxu0 %v1610_v0  ;;  %1236 = vmatprep.subr.bf16.mxu1 %v1610_v0  ;;  %v1392_v6 = vld [vmem:[%s1958_s9] sm:$0xff]  }
  0x7e   :  { %v1396_v10 = vld [vmem:[%s1958_s9 + $0x20] sm:$0xff]  }
  0x80   :  { %1217 = vmatpush3.bf16.msra.mxu0 %v1347_v7  ;;  %1237 = vmatpush3.bf16.msra.mxu1 %v1356_v12  ;;  %v1393_v7 = vld [vmem:[%s1958_s9 + $0x8] sm:$0xff]   ;;  %v1398_v12 = vld [vmem:[%s1958_s9 + $0x30] sm:$0xff]  }
  0x81   :  { %1218 = vmatprep.subr.bf16.mxu0 %v1610_v0  ;;  %1238 = vmatprep.subr.bf16.mxu1 %v1610_v0 }
  0x84   :  { %1219 = vmatpush3.bf16.msra.mxu0 %v1348_v9  ;;  %1239 = vmatpush3.bf16.msra.mxu1 %v1357_v14  ;;  %v1395_v9 = vld [vmem:[%s1958_s9 + $0x18] sm:$0xff]   ;;  %v498_v14 = vlaneseq }
  0x85   :  { %1220 = vmatprep.subr.bf16.mxu0 %v1610_v0  ;;  %1240 = vmatprep.subr.bf16.mxu1 %v1610_v0 }
  0x88   :  { %1221 = vmatpush3.bf16.msra.mxu0 %v1349_v11  ;;  %1241 = vmatpush3.bf16.msra.mxu1 %v1358_v16  ;;  %v1397_v11 = vld [vmem:[%s1958_s9 + $0x28] sm:$0xff]  }
  0x89   :  { %1222 = vmatprep.subr.bf16.mxu0 %v1610_v0  ;;  %1242 = vmatprep.subr.bf16.mxu1 %v1610_v0 }
  0x8c   :  { %1223 = vmatpush3.bf16.msra.mxu0 %v1350_v13  ;;  %1243 = vmatpush3.bf16.msra.mxu1 %v1359_v17  ;;  %v1399_v13 = vld [vmem:[%s1958_s9 + $0x38] sm:$0xff]   ;;  %v496_v17 = vld [vmem:[%s1957_s8] sm:$0x3] }
  0x8d   :  { %1248 = vmatprep.subr.bf16.mxu0 %v1610_v0  ;;  %588 = vmatprep.subr.bf16.mxu1 %v1370_v35 }
  0x8f   :  { %1225 = vmatmul.mubr.bf16.vlgmr.msra.gmra.mrb[0].mxu0 %v1351_v15  ;;  %v499_v15 = vshrl.u32 %v498_v14, 7 }
  0x90   :  { %1264 = vmatprep.mubr.msk.bf16.mxu0 %vm1611_vm0, %v1610_v0  ;;  %1249 = vmatpush3.bf16.msra.mxu0 %v1360_v18 }
  0x91   :  { %1250 = vmatprep.subr.bf16.mxu0 %v1610_v0  ;;  %v504_v16 = vsub.s32 1, %v499_v15 }
  0x93   :  { %v505_v18 = vrot.slane %v496_v17, %v504_v16 }
  0x94   :  { %1251 = vmatpush3.bf16.msra.mxu0 %v1361_v19 }
  0x95   :  { %1252 = vmatprep.subr.bf16.mxu0 %v1610_v0 }
  0x98   :  { %1253 = vmatpush3.bf16.msra.mxu0 %v1362_v20 }
  0x99   :  { %1254 = vmatprep.subr.bf16.mxu0 %v1610_v0 }
  0x9c   :  { %1255 = vmatpush3.bf16.msra.mxu0 %v1363_v21 }
  0x9d   :  { %1256 = vmatprep.subr.bf16.mxu0 %v1610_v0 }
  0xa0   :  { %1257 = vmatpush3.bf16.msra.mxu0 %v1364_v22 }
  0xa1   :  { %1258 = vmatprep.subr.bf16.mxu0 %v1610_v0 }
  0xa4   :  { %1259 = vmatpush3.bf16.msra.mxu0 %v1365_v23 }
  0xa5   :  { %1260 = vmatprep.subr.bf16.mxu0 %v1610_v0 }
  0xa8   :  { %1261 = vmatpush3.bf16.msra.mxu0 %v1366_v32 }
  0xa9   :  { %1262 = vmatprep.subr.bf16.mxu0 %v1610_v0 }
  0xac   :  { %1263 = vmatpush3.bf16.msra.mxu0 %v1367_v33 }
  0xad   :  { %1268 = vmatprep.subr.bf16.mxu0 %v1610_v0 }
 0x162   :  { %v244_v25 = vpop.f32.mrb[0].mxu0 }
 0x163   :  { %v1226_v26 = vpop.f32.mrb[1].mxu0  ;;  %v245_v28 = vadd.f32 %v1078_v24, %v244_v25 }
 0x164   :  { %v247_v27 = vpop.f32.mrb[2].mxu0  ;;  %v500_v26 = vsub.s32 0, %v499_v15 }
 0x165   :  { %v248_v29 = vadd.f32 %v1078_v24, %v247_v27  ;;  %v1227_v30 = vpop.f32.mrb[3].mxu0 }
 0x167   :  { %v251_v31 = vpack.c.bf16 %v248_v29, %v245_v28  ;;  %v501_v28 = vrot.slane %v496_v17, %v500_v26  ;;  %v1403_v26 = vld [vmem:[#allocation10 + $0x18] sm:$0xff]  }
 0x169   :  { %1245 = vmatmul.mubr.bf16.vlgmr.msra.gmra.mrb[0].mxu1 %v251_v31 }
 0x16a   :  { %589 = vmatpush1.bf16.msra.mxu1 %v1368_v34  ;;  %620 = vmatprep.mubr.bf16.mxu1 %v1612_v60 }
 0x16b   :  { %590 = vmatprep.subr.bf16.mxu1 %v1373_v36 }
 0x16e   :  { %591 = vmatpush1.bf16.msra.mxu1 %v1371_v37 }
 0x16f   :  { %592 = vmatprep.subr.bf16.mxu1 %v1376_v38 }
 0x172   :  { %593 = vmatpush1.bf16.msra.mxu1 %v1374_v39 }
 0x173   :  { %594 = vmatprep.subr.bf16.mxu1 %v1379_v40 }
 0x176   :  { %595 = vmatpush1.bf16.msra.mxu1 %v1377_v41 }
 0x177   :  { %596 = vmatprep.subr.bf16.mxu1 %v1382_v42  ;;  %v1400_v42 = vld [vmem:[#allocation10] sm:$0xff]  }
 0x17a   :  { %597 = vmatpush1.bf16.msra.mxu1 %v1380_v43  ;;  %v1401_v43 = vld [vmem:[#allocation10 + $0x8] sm:$0xff]  }
 0x17b   :  { %598 = vmatprep.subr.bf16.mxu1 %v1385_v44 }
 0x17e   :  { %599 = vmatpush1.bf16.msra.mxu1 %v1383_v45 }
 0x17f   :  { %600 = vmatprep.subr.bf16.mxu1 %v1388_v46 }
 0x182   :  { %601 = vmatpush1.bf16.msra.mxu1 %v1386_v47 }
 0x183   :  { %602 = vmatprep.subr.bf16.mxu1 %v1391_v58 }
 0x186   :  { %603 = vmatpush1.bf16.msra.mxu1 %v1389_v59 }
 0x187   :  { %1288 = vmatprep.subr.bf16.mxu1 %v1610_v0 }
 0x23c   :  { %v357_v49 = vpop.f32.mrb[0].mxu1 }
 0x23d   :  { %v358_v50 = vadd.f32 %v1088_v48, %v357_v49  ;;  %v1246_v51 = vpop.f32.mrb[1].mxu1 }
 0x23e   :  { %v360_v52 = vpop.f32.mrb[2].mxu1 }
 0x23f   :  { %v361_v53 = vadd.f32 %v1088_v48, %v360_v52  ;;  %v1247_v54 = vpop.f32.mrb[3].mxu1  ;;  %v364_v55 = vmax.f32 %v358_v50, 0.0 }
 0x241   :  { %v365_v56 = vmax.f32 %v361_v53, 0.0 }
 0x243   :  { %v366_v57 = vpack.c.bf16 %v365_v56, %v364_v55 }
 0x245   :  { %1265 = vmatmul.mubr.bf16.vlgmr.msra.gmra.mrb[4].mxu0 %v366_v57 }
 0x246   :  { %1284 = vmatprep.mubr.msk.bf16.mxu0 %vm1611_vm0, %v1610_v0  ;;  %1269 = vmatpush3.bf16.msra.mxu0 %v1392_v6 }
 0x247   :  { %1270 = vmatprep.subr.bf16.mxu0 %v1610_v0 }
 0x24a   :  { %1271 = vmatpush3.bf16.msra.mxu0 %v1393_v7 }
 0x24b   :  { %1272 = vmatprep.subr.bf16.mxu0 %v1610_v0 }
 0x24e   :  { %1273 = vmatpush3.bf16.msra.mxu0 %v1394_v8 }
 0x24f   :  { %1274 = vmatprep.subr.bf16.mxu0 %v1610_v0 }
 0x252   :  { %1275 = vmatpush3.bf16.msra.mxu0 %v1395_v9 }
 0x253   :  { %1276 = vmatprep.subr.bf16.mxu0 %v1610_v0 }
 0x256   :  { %1277 = vmatpush3.bf16.msra.mxu0 %v1396_v10 }
 0x257   :  { %1278 = vmatprep.subr.bf16.mxu0 %v1610_v0 }
 0x25a   :  { %1279 = vmatpush3.bf16.msra.mxu0 %v1397_v11 }
 0x25b   :  { %1280 = vmatprep.subr.bf16.mxu0 %v1610_v0 }
 0x25e   :  { %1281 = vmatpush3.bf16.msra.mxu0 %v1398_v12 }
 0x25f   :  { %1282 = vmatprep.subr.bf16.mxu0 %v1610_v0 }
 0x262   :  { %1283 = vmatpush3.bf16.msra.mxu0 %v1399_v13 }
 0x263   :  { %1308 = vmatprep.subr.bf16.mxu0 %v1610_v0 }
 0x318   :  { %v472_v62 = vpop.f32.mrb[4].mxu0 }
 0x319   :  { %v1266_v63 = vpop.f32.mrb[5].mxu0  ;;  %v1864_v2 = vadd.f32 %v1097_v61, %v472_v62 }
 0x31a   :  { %v475_v1 = vpop.f32.mrb[6].mxu0 }
 0x31b   :  { %v1866_v3 = vadd.f32 %v1097_v61, %v475_v1  ;;  %v1267_v4 = vpop.f32.mrb[7].mxu0 }
 0x31d   :  { %v479_v5 = vpack.c.bf16 %v1866_v3, %v1864_v2 }
 0x31f   :  { %621 = vmatmul.mubr.bf16.vlgmr.msra.gmra.mrb[4].mxu1 %v479_v5 }
 0x320   :  { %1304 = vmatprep.mubr.msk.bf16.mxu1 %vm1611_vm0, %v1610_v0  ;;  %1289 = vmatpush3.bf16.msra.mxu1 %v1400_v42 }
 0x321   :  { %1290 = vmatprep.subr.bf16.mxu1 %v1610_v0 }
 0x324   :  { %1291 = vmatpush3.bf16.msra.mxu1 %v1401_v43 }
 0x325   :  { %1292 = vmatprep.subr.bf16.mxu1 %v1610_v0 }
 0x3f2   :  { %v622_v19 = vpop.f32.mrb[4].mxu1 }
 0x3f3   :  { %v624_v20 = vpop.f32.mrb[5].mxu1  ;;  %v623_v29 = vadd.f32 %v622_v19, %v501_v28 }
 0x3f4   :  { %v625_v21 = vadd.f32 %v624_v20, %v505_v18  ;;  %v626_v22 = vpop.f32.mrb[6].mxu1 }
 0x3f5   :  { %v628_v23 = vpop.f32.mrb[7].mxu1  ;;  %v627_v31 = vadd.f32 %v626_v22, %v501_v28  ;;  %v1405_v28 = vld [vmem:[#allocation10 + $0x28] sm:$0xff]  }
 0x3f6   :  { %v1122_v24 = vmul.f32 -1.442695, %v625_v21  ;;  %v629_v25 = vadd.f32 %v628_v23, %v505_v18 }
 0x3f8   :  { %1416 = vpow2.f32 %v1122_v24  ;;  %v1123_v27 = vmul.f32 -1.442695, %v629_v25  ;;  %v1402_v24 = vld [vmem:[#allocation10 + $0x10] sm:$0xff]  }
 0x3f9   :  { %1293 = vmatpush3.bf16.msra.mxu1 %v1402_v24 }
 0x3fa   :  { %1418 = vpow2.f32 %v1123_v27  ;;  %1294 = vmatprep.subr.bf16.mxu1 %v1610_v0  ;;  %v1404_v27 = vld [vmem:[#allocation10 + $0x20] sm:$0xff]  }
 0x3fb   :  { %1420 = vtanh.f32 %v623_v29  ;;  %v1406_v29 = vld [vmem:[#allocation10 + $0x30] sm:$0xff]  }
 0x3fd   :  { %1295 = vmatpush3.bf16.msra.mxu1 %v1403_v26 }
 0x3fe   :  { %1296 = vmatprep.subr.bf16.mxu1 %v1610_v0 }
 0x401   :  { %1297 = vmatpush3.bf16.msra.mxu1 %v1404_v27 }
 0x402   :  { %v1417_v30 = vpop.eup %1416  ;;  %1298 = vmatprep.subr.bf16.mxu1 %v1610_v0 }
 0x403   :  { %v639_v32 = vadd.f32 1.0, %v1417_v30  ;;  %v1407_v30 = vld [vmem:[#allocation10 + $0x38] sm:$0xff]  }
 0x404   :  { %v1419_v33 = vpop.eup %1418 }
 0x405   :  { %1422 = vrcp.f32 %v639_v32  ;;  %v640_v34 = vadd.f32 1.0, %v1419_v33  ;;  %v1421_v35 = vpop.eup %1420  ;;  %1299 = vmatpush3.bf16.msra.mxu1 %v1405_v28  ;;  %v1409_v32 = vld [vmem:[#allocation11 + $0x8] sm:$0xff]   ;;  %v1410_v33 = vld [vmem:[#allocation11 + $0x10] sm:$0xff]  }
 0x406   :  { %1424 = vtanh.f32 %v627_v31  ;;  %1300 = vmatprep.subr.bf16.mxu1 %v1610_v0  ;;  %v1408_v31 = vld [vmem:[#allocation11] sm:$0xff]  }
 0x407   :  { %1426 = vrcp.f32 %v640_v34  ;;  %v1411_v34 = vld [vmem:[#allocation11 + $0x18] sm:$0xff]  }
 0x409   :  { %1301 = vmatpush3.bf16.msra.mxu1 %v1406_v29 }
 0x40a   :  { %1302 = vmatprep.subr.bf16.mxu1 %v1610_v0 }
 0x40d   :  { %1303 = vmatpush3.bf16.msra.mxu1 %v1407_v30 }
 0x40f   :  { %v1423_v36 = vpop.eup %1422 }
 0x410   :  { %v1425_v37 = vpop.eup %1424  ;;  %v645_v38 = vmul.f32 %v1423_v36, %v1421_v35  ;;  %v1412_v35 = vld [vmem:[#allocation11 + $0x20] sm:$0xff]   ;;  %v1413_v36 = vld [vmem:[#allocation11 + $0x28] sm:$0xff]  }
 0x411   :  { %v1427_v39 = vpop.eup %1426 }
 0x412   :  { %v646_v40 = vmul.f32 %v1427_v39, %v1425_v37  ;;  %v1152_v37 = vpack.c.bf16 %v1864_v2, %v1864_v2 }
 0x414   :  { %v647_v41 = vpack.c.bf16 %v646_v40, %v645_v38  ;;  %v1153_v38 = vpack.c.bf16 %v1866_v3, %v1866_v3  ;;  %v799_v39 = vunpack.c.l.bf16 %v1152_v37 }
 0x416   :  { %1285 = vmatmul.mubr.bf16.vlgmr.msra.gmra.mrb[8].mxu0 %v647_v41  ;;  %v800_v43 = vunpack.c.l.bf16 %v1153_v38 }
 0x417   :  { %1324 = vmatprep.mubr.msk.bf16.mxu0 %vm1611_vm0, %v1610_v0  ;;  %1309 = vmatpush3.bf16.msra.mxu0 %v1408_v31 }
 0x418   :  { %1310 = vmatprep.subr.bf16.mxu0 %v1610_v0 }
 0x41b   :  { %1311 = vmatpush3.bf16.msra.mxu0 %v1409_v32 }
 0x41c   :  { %1312 = vmatprep.subr.bf16.mxu0 %v1610_v0 }
 0x41f   :  { %1313 = vmatpush3.bf16.msra.mxu0 %v1410_v33 }
 0x420   :  { %1314 = vmatprep.subr.bf16.mxu0 %v1610_v0 }
 0x423   :  { %1315 = vmatpush3.bf16.msra.mxu0 %v1411_v34 }
 0x424   :  { %1316 = vmatprep.subr.bf16.mxu0 %v1610_v0 }
 0x427   :  { %1317 = vmatpush3.bf16.msra.mxu0 %v1412_v35 }
 0x428   :  { %1318 = vmatprep.subr.bf16.mxu0 %v1610_v0 }
 0x42b   :  { %1319 = vmatpush3.bf16.msra.mxu0 %v1413_v36 }
 0x42c   :  { %1320 = vmatprep.subr.bf16.mxu0 %v1610_v0 }
 0x4e9   :  { %v746_v44 = vpop.f32.mrb[8].mxu0 }
 0x4ea   :  { %v754_v45 = vsel %vm753_vm1, %v746_v44, -inf  ;;  %v1286_v46 = vpop.f32.mrb[9].mxu0 }
 0x4eb   :  { %v755_v47 = vrot.slane %v754_v45, 4  ;;  %v749_v48 = vpop.f32.mrb[10].mxu0 }
 0x4ec   :  { %v761_v49 = vsel %vm753_vm1, %v749_v48, -inf  ;;  %v1287_v50 = vpop.f32.mrb[11].mxu0 }
 0x4ed   :  { %v756_v51 = vmax.f32 %v754_v45, %v755_v47  ;;  %v762_v52 = vrot.slane %v761_v49, 4 }
 0x4ef   :  { %v757_v53 = vrot.slane %v756_v51, 2  ;;  %v763_v54 = vmax.f32 %v761_v49, %v762_v52 }
 0x4f1   :  { %v758_v55 = vmax.f32 %v756_v51, %v757_v53  ;;  %v764_v56 = vrot.slane %v763_v54, 2 }
 0x4f3   :  { %v759_v57 = vrot.slane %v758_v55, 1  ;;  %v765_v58 = vmax.f32 %v763_v54, %v764_v56 }
 0x4f5   :  { %v760_v59 = vmax.f32 %v758_v55, %v759_v57  ;;  %v766_v60 = vrot.slane %v765_v58, 1 }
 0x4f7   :  { %v768_v61 = vsub.f32 %v746_v44, %v760_v59  ;;  %v767_v62 = vmax.f32 %v765_v58, %v766_v60 }
 0x4f9   :  { %v770_v63 = vmul.f32 1.442695, %v768_v61  ;;  %v769_v1 = vsub.f32 %v749_v48, %v767_v62  ;;  %v1414_v61 = vld [vmem:[#allocation11 + $0x30] sm:$0xff]   ;;  %v1415_v62 = vld [vmem:[#allocation11 + $0x38] sm:$0xff]  }
 0x4fa   :  { %1321 = vmatpush3.bf16.msra.mxu0 %v1414_v61 }
 0x4fb   :  { %1428 = vpow2.f32 %v770_v63  ;;  %v772_v4 = vmul.f32 1.442695, %v769_v1  ;;  %1322 = vmatprep.subr.bf16.mxu0 %v1610_v0  ;;  %v1134_v63 = vld [vmem:[%s1960_s11] ss:$0 sm:$0xff]  ;;  %s1568_s11 = scalar_lea.vmem %s1067_s20, 32 }
 0x4fc   :  { %p1569_p6 = scmp.ne.s32.totalorder %s1067_s20, %s1568_s11  ;;  %p1574_p8 = scmp.lt.s32.totalorder %s1568_s11, %s1568_s11 }
 0x4fd   :  { %1430 = vpow2.f32 %v772_v4 }
 0x4fe   :  { %1323 = vmatpush3.bf16.msra.mxu0 %v1415_v62  ;;  %p1575_p9 = por %p1574_p8, %p1573_p7 }
 0x500   :  { %p1576_p10 = pnand %p1575_p9, %p1569_p6 }
 0x505   :  { %v1429_v5 = vpop.eup %1428 }
 0x506   :  { %v774_v6 = vsel %vm753_vm1, %v1429_v5, 0.0 }
 0x507   :  { %v1431_v7 = vpop.eup %1430  ;;  %v775_v8 = vrot.slane %v774_v6, 4 }
 0x508   :  { %v781_v9 = vsel %vm753_vm1, %v1431_v7, 0.0 }
 0x509   :  { %v776_v10 = vadd.f32 %v775_v8, %v774_v6  ;;  %v782_v11 = vrot.slane %v781_v9, 4 }
 0x50b   :  { %v777_v12 = vrot.slane %v776_v10, 2  ;;  %v783_v13 = vadd.f32 %v782_v11, %v781_v9 }
 0x50d   :  { %v778_v14 = vadd.f32 %v777_v12, %v776_v10  ;;  %v784_v15 = vrot.slane %v783_v13, 2  ;;  %v1143_v10 = vld [vmem:[%s1962_s13] ss:$0 sm:$0xff] }
 0x50f   :  { %v779_v16 = vrot.slane %v778_v14, 1  ;;  %v785_v17 = vadd.f32 %v784_v15, %v783_v13 }
 0x511   :  { %v780_v18 = vadd.f32 %v779_v16, %v778_v14  ;;  %v786_v19 = vrot.slane %v785_v17, 1 }
 0x513   :  { %1432 = vrcp.f32 %v780_v18  ;;  %v787_v20 = vadd.f32 %v786_v19, %v785_v17 }
 0x515   :  { %1434 = vrcp.f32 %v787_v20 }
 0x51d   :  { %v1433_v21 = vpop.eup %1432 }
 0x51e   :  { %v790_v22 = vmul.f32 %v1433_v21, %v1429_v5 }
 0x51f   :  { %v1435_v23 = vpop.eup %1434 }
 0x520   :  { %803 = vperm.xlu0 %1342, %v790_v22   ;;  %v791_v25 = vmul.f32 %v1435_v23, %v1431_v7 }
 0x524   :  { %808 = vperm.xlu0 %1342, %v791_v25  }
 0x59f   :  { %v804_v40 = vpop.permute.xlu0 %803 }
 0x5a0   :  { %v811_v41 = vmul.f32 %v804_v40, %v799_v39 }
 0x5a2   :  { %v813_v42 = vrot.slane %v811_v41, 4 }
 0x5a3   :  { %v809_v44 = vpop.permute.xlu0 %808 }
 0x5a4   :  { %v814_v45 = vadd.f32 %v813_v42, %v811_v41  ;;  %v812_v46 = vmul.f32 %v809_v44, %v800_v43 }
 0x5a6   :  { %v815_v47 = vrot.slane %v814_v45, 2  ;;  %v819_v48 = vrot.slane %v812_v46, 4 }
 0x5a8   :  { %v816_v49 = vadd.f32 %v815_v47, %v814_v45  ;;  %v820_v50 = vadd.f32 %v819_v48, %v812_v46 }
 0x5aa   :  { %v817_v51 = vrot.slane %v816_v49, 1  ;;  %v821_v52 = vrot.slane %v820_v50, 2 }
 0x5ac   :  { %v818_v53 = vadd.f32 %v817_v51, %v816_v49  ;;  %v822_v54 = vadd.f32 %v821_v52, %v820_v50 }
 0x5ae   :  { %v823_v2 = vrot.slane %v822_v54, 1  ;;  %v825_v55 = vpack.c.bf16 %v818_v53, %v818_v53 }
 0x5b0   :  { %v824_v56 = vadd.f32 %v823_v2, %v822_v54  ;;  %v852_v57 = vunpack.c.l.b16 %v825_v55 }
 0x5b2   :  { %v826_v3 = vpack.c.bf16 %v824_v56, %v824_v56 }
 0x5b4   :  { %v853_v58 = vunpack.c.l.b16 %v826_v3 }
 0x5b6   :  { %v855_v59 = vsel %vm854_vm2, %v853_v58, %v852_v57 }
 0x5b7   :  { %v856_v60 = vpack.c.b16 %v855_v59, %v855_v59 }
 0x5b9   :  { %1305 = vmatmul.mubr.bf16.vlgmr.msra.gmra.mrb[8].mxu1 %v856_v60 }
 0x68c   :  { %v940_v1 = vpop.f32.mrb[8].mxu1 }
 0x68d   :  { %v941_v4 = vadd.f32 %v1134_v63, %v940_v1  ;;  %v1306_v5 = vpop.f32.mrb[9].mxu1 }
 0x68e   :  { %v943_v6 = vpop.f32.mrb[10].mxu1 }
 0x68f   :  { %v946_v7 = vmax.f32 %v941_v4, 0.0  ;;  %v1307_v8 = vpop.f32.mrb[11].mxu1 }
 0x691   :  { %v947_v9 = vpack.c.bf16 %v946_v7, %v946_v7 }
 0x693   :  { %1325 = vmatmul.mubr.bf16.vlgmr.msra.gmra.mrb[12].mxu0 %v947_v9 }
 0x766   :  { %v1053_v0 = vpop.f32.mrb[12].mxu0 }
 0x767   :  { %v1054_v11 = vadd.f32 %v1143_v10, %v1053_v0  ;;  %v1326_v12 = vpop.f32.mrb[13].mxu0 }
 0x768   :  { %v1056_v13 = vpop.f32.mrb[14].mxu0 }
 0x769   :  { %1059 = vst [vmem:[#allocation13] sm:$0x3] %v1054_v11  ;;  %v1327_v14 = vpop.f32.mrb[15].mxu0 }
 0x76a   :  { %1579 = shalt.err (!%p1576_p10)
}
 0x76b   :  { %s1580_s13 = scalar_lea.hbm %s1963_s14, 32 }
 0x76c   :  { %p1581_p11 = scmp.ne.s32.totalorder %s1963_s14, %s1580_s13  ;;  %p1584_p12 = scmp.lt.u32.totalorder %s1580_s13, %s1963_s14 }
 0x76e   :  { %p1586_p13 = pnand %p1584_p12, %p1581_p11 }
 0x770   :  { %1589 = shalt.err (!%p1586_p13)
}
 0x771   :  { %1069 = dma.vmem_to_hbm [thread:$0]  %s1067_s20, 32, %s1963_s14, [#allocation4]  }
 0x772   :  { %1598 = dma.done.wait [#allocation4], 32  }
 0x773   :  { %1599 = vsyncadd [#allocation4], 4294967264 }
 0x774   :  { %1073 = vsyncpa [#allocation3], 1 }
 0x775   :  { %1074 = vsyncpa [#allocation6], 1 }
 0x776   :  { %1075 = vsyncpa [#allocation9], 1 }
 0x777   :  { %1076 = vsyncpa [#allocation12], 1 }
 0x778   :  { %1077 = vsyncpa [#allocation4], 1 }

// kernel: tpu_custom_call.1
= control target key start
LH: loop header
LB: loop body
LE: loop exit
PB: predicated region body
PF: predicated region fallthrough
CT: control target
= control target key end

     0   :  { %19 = vsyncpa [#allocation3], 0  ;;  %s1949_s0 = inlined_call_operand.hbm [shape: bf16[2,8,128], index: 0, kind: input, shape index: {}]   ;;  %s1950_s1 = inlined_call_operand.vmem [shape: bf16[128,128], index: 1, kind: input, shape index: {}]   ;;  %s1951_s2 = inlined_call_operand.vmem [shape: f32[1,128], index: 2, kind: input, shape index: {}]   ;;  %s1952_s3 = inlined_call_operand.hbm [shape: bf16[128,128], index: 3, kind: input, shape index: {}]   ;;  %s1953_s4 = inlined_call_operand.vmem [shape: f32[1,128], index: 4, kind: input, shape index: {}]   ;;  %s1954_s5 = inlined_call_operand.hbm [shape: bf16[128,128], index: 5, kind: input, shape index: {}]   ;;  %s1955_s6 = inlined_call_operand.vmem [shape: f32[1,128], index: 6, kind: input, shape index: {}]   ;;  %s1956_s7 = inlined_call_operand.hbm [shape: bf16[128,256], index: 7, kind: input, shape index: {}]   ;;  %s1957_s8 = inlined_call_operand.vmem [shape: f32[1,256], index: 8, kind: input, shape index: {}]   ;;  %s1958_s9 = inlined_call_operand.vmem [shape: bf16[128,1], index: 9, kind: input, shape index: {}]   ;;  %s1959_s10 = inlined_call_operand.hbm [shape: bf16[128,128], index: 10, kind: input, shape index: {}]   ;;  %s1960_s11 = inlined_call_operand.vmem [shape: f32[1,128], index: 11, kind: input, shape index: {}]   ;;  %s1961_s12 = inlined_call_operand.hbm [shape: bf16[128,128], index: 12, kind: input, shape index: {}]   ;;  %s1962_s13 = inlined_call_operand.vmem [shape: f32[1,128], index: 13, kind: input, shape index: {}]   ;;  %s1963_s14 = inlined_call_operand.hbm [shape: f32[2,128], index: 14, kind: output, shape index: {}]  }
   0x1   :  { %20 = vsyncpa [#allocation6], 0 }
   0x2   :  { %21 = vsyncpa [#allocation9], 0 }
   0x3   :  { %22 = vsyncpa [#allocation12], 0 }
   0x4   :  { %23 = vsyncpa [#allocation4], 0  ;;  %s1600_s29 = smov [#allocation5]   ;;  %s1601_s15 = smov [#allocation8]  }
   0x5   :  { %s45_s30 = sshll.u32 %s1600_s29, 4  ;;  %s73_s16 = sshll.u32 %s1601_s15, 4  ;;  %s46_s30 = int_to_ptr.vmem [resolvable:$true] %s45_s30  ;;  %s1689_s16 = int_to_ptr.vmem [resolvable:$true] %s73_s16 }
   0x6   :  { %s1436_s19 = scalar_lea.hbm %s1952_s3, 1024 }
   0x7   :  { %p1437_p0 = scmp.ne.s32.totalorder %s1952_s3, %s1436_s19  ;;  %p1440_p1 = scmp.lt.u32.totalorder %s1436_s19, %s1952_s3 }
   0x9   :  { %p1442_p2 = pnand %p1440_p1, %p1437_p0 }
   0xb   :  { %1445 = shalt.err (!%p1442_p2)
}
   0xc   :  { %s1446_s24 = scalar_lea.vmem %s46_s30, 1024  ;;  %p1451_p4 = scmp.lt.s32.totalorder %s46_s30, %s46_s30 }
   0xd   :  { %p1447_p3 = scmp.ne.s32.totalorder %s46_s30, %s1446_s24  ;;  %p1452_p5 = scmp.lt.s32.totalorder %s1446_s24, %s1446_s24 }
   0xf   :  { %p1453_p6 = por %p1452_p5, %p1451_p4 }
  0x11   :  { %p1454_p7 = pnand %p1453_p6, %p1447_p3 }
  0x13   :  { %1457 = shalt.err (!%p1454_p7)
}
  0x14   :  { %s1964_s25 = smov 64   ;;  %s1603_s26 = smov 4  }
  0x15   :  { %51 = dma.hbm_to_vmem [thread:$0]  %s1952_s3, 1024, %s46_s30, [#allocation6], %s1964_s25, %s1964_s25, %s1603_s26  }
  0x16   :  { %s1458_s17 = scalar_lea.hbm %s1956_s7, 2048 }
  0x17   :  { %p1459_p8 = scmp.ne.s32.totalorder %s1956_s7, %s1458_s17  ;;  %p1462_p9 = scmp.lt.u32.totalorder %s1458_s17, %s1956_s7 }
  0x19   :  { %p1464_p10 = pnand %p1462_p9, %p1459_p8 }
  0x1b   :  { %1467 = shalt.err (!%p1464_p10)
}
  0x1c   :  { %s1468_s22 = scalar_lea.vmem %s1689_s16, 2048  ;;  %p1473_p12 = scmp.lt.s32.totalorder %s1689_s16, %s1689_s16 }
  0x1d   :  { %p1469_p11 = scmp.ne.s32.totalorder %s1689_s16, %s1468_s22  ;;  %p1474_p13 = scmp.lt.s32.totalorder %s1468_s22, %s1468_s22 }
  0x1f   :  { %p1475_p0 = por %p1474_p13, %p1473_p12 }
  0x21   :  { %p1476_p1 = pnand %p1475_p0, %p1469_p11 }
  0x23   :  { %1479 = shalt.err (!%p1476_p1)
}
  0x24   :  { %s1604_s3 = smov 128   ;;  %s1605_s30 = smov 8  }
  0x25   :  { %79 = dma.hbm_to_vmem [thread:$0]  %s1956_s7, 2048, %s1689_s16, [#allocation9], %s1604_s3, %s1604_s3, %s1605_s30  }
  0x26   :  { %s1606_s27 = smov [#allocation2]   ;;  %s1607_s29 = smov [#allocation7]  }
  0x27   :  { %s29_s28 = sshll.u32 %s1606_s27, 4  ;;  %s59_s15 = sshll.u32 %s1607_s29, 4  ;;  %s30_s28 = int_to_ptr.vmem [resolvable:$true] %s29_s28  ;;  %s1723_s15 = int_to_ptr.vmem [resolvable:$true] %s59_s15 }
  0x28   :  { %s1480_s19 = scalar_lea.hbm %s1949_s0, 128 }
  0x29   :  { %p1481_p2 = scmp.ne.s32.totalorder %s1949_s0, %s1480_s19  ;;  %p1484_p3 = scmp.lt.u32.totalorder %s1480_s19, %s1949_s0 }
  0x2b   :  { %p1486_p4 = pnand %p1484_p3, %p1481_p2 }
  0x2d   :  { %1489 = shalt.err (!%p1486_p4)
}
  0x2e   :  { %s1490_s7 = scalar_lea.vmem %s30_s28, 128  ;;  %p1495_p6 = scmp.lt.s32.totalorder %s30_s28, %s30_s28 }
  0x2f   :  { %p1491_p5 = scmp.ne.s32.totalorder %s30_s28, %s1490_s7  ;;  %p1496_p7 = scmp.lt.s32.totalorder %s1490_s7, %s1490_s7 }
  0x31   :  { %p1497_p8 = por %p1496_p7, %p1495_p6 }
  0x33   :  { %p1498_p9 = pnand %p1497_p8, %p1491_p5 }
  0x35   :  { %1501 = shalt.err (!%p1498_p9)
}
  0x36   :  { %s1966_s16 = smov 64   ;;  %s1502_s25 = scalar_lea.hbm %s1954_s5, 1024 }
  0x37   :  { %35 = dma.hbm_to_vmem [thread:$0]  %s1949_s0, 128, %s30_s28, [#allocation3], %s1966_s16, %s1966_s16, %s1603_s26  }
  0x38   :  { %p1503_p10 = scmp.ne.s32.totalorder %s1954_s5, %s1502_s25  ;;  %p1506_p11 = scmp.lt.u32.totalorder %s1502_s25, %s1954_s5 }
  0x3a   :  { %p1508_p12 = pnand %p1506_p11, %p1503_p10 }
  0x3c   :  { %1511 = shalt.err (!%p1508_p12)
}
  0x3d   :  { %s1512_s19 = scalar_lea.vmem %s1723_s15, 1024  ;;  %p1517_p0 = scmp.lt.s32.totalorder %s1723_s15, %s1723_s15 }
  0x3e   :  { %p1513_p13 = scmp.ne.s32.totalorder %s1723_s15, %s1512_s19  ;;  %p1518_p1 = scmp.lt.s32.totalorder %s1512_s19, %s1512_s19 }
  0x40   :  { %p1519_p2 = por %p1518_p1, %p1517_p0 }
  0x42   :  { %p1520_p3 = pnand %p1519_p2, %p1513_p13 }
  0x44   :  { %1523 = shalt.err (!%p1520_p3)
}
  0x45   :  { %65 = dma.hbm_to_vmem [thread:$0]  %s1954_s5, 1024, %s1723_s15, [#allocation6], %s1966_s16, %s1966_s16, %s1603_s26  }
  0x46   :  { %s1608_s20 = smov [#allocation10]   ;;  %s1609_s22 = smov [#allocation11]  }
  0x47   :  { %s89_s21 = sshll.u32 %s1608_s20, 4  ;;  %s103_s7 = sshll.u32 %s1609_s22, 4  ;;  %s90_s21 = int_to_ptr.vmem [resolvable:$true] %s89_s21  ;;  %s1760_s7 = int_to_ptr.vmem [resolvable:$true] %s103_s7 }
  0x48   :  { %s1524_s23 = scalar_lea.hbm %s1959_s10, 1024 }
  0x49   :  { %p1525_p4 = scmp.ne.s32.totalorder %s1959_s10, %s1524_s23  ;;  %p1528_p5 = scmp.lt.u32.totalorder %s1524_s23, %s1959_s10 }
  0x4b   :  { %p1530_p6 = pnand %p1528_p5, %p1525_p4 }
  0x4d   :  { %1533 = shalt.err (!%p1530_p6)
}
  0x4e   :  { %s1534_s5 = scalar_lea.vmem %s90_s21, 1024  ;;  %p1539_p8 = scmp.lt.s32.totalorder %s90_s21, %s90_s21 }
  0x4f   :  { %p1535_p7 = scmp.ne.s32.totalorder %s90_s21, %s1534_s5  ;;  %p1540_p9 = scmp.lt.s32.totalorder %s1534_s5, %s1534_s5 }
  0x51   :  { %p1541_p10 = por %p1540_p9, %p1539_p8 }
  0x53   :  { %p1542_p11 = pnand %p1541_p10, %p1535_p7 }
  0x55   :  { %1545 = shalt.err (!%p1542_p11)
}
  0x56   :  { %95 = dma.hbm_to_vmem [thread:$0]  %s1959_s10, 1024, %s90_s21, [#allocation9], %s1966_s16, %s1966_s16, %s1603_s26  }
  0x57   :  { %s1546_s0 = scalar_lea.hbm %s1961_s12, 1024 }
  0x58   :  { %p1547_p12 = scmp.ne.s32.totalorder %s1961_s12, %s1546_s0  ;;  %p1550_p13 = scmp.lt.u32.totalorder %s1546_s0, %s1961_s12 }
  0x5a   :  { %p1552_p0 = pnand %p1550_p13, %p1547_p12 }
  0x5c   :  { %1555 = shalt.err (!%p1552_p0)
}
  0x5d   :  { %s1556_s30 = scalar_lea.vmem %s1760_s7, 1024  ;;  %p1561_p2 = scmp.lt.s32.totalorder %s1760_s7, %s1760_s7 }
  0x5e   :  { %p1557_p1 = scmp.ne.s32.totalorder %s1760_s7, %s1556_s30  ;;  %p1562_p3 = scmp.lt.s32.totalorder %s1556_s30, %s1556_s30 }
  0x60   :  { %p1563_p4 = por %p1562_p3, %p1561_p2 }
  0x62   :  { %p1564_p5 = pnand %p1563_p4, %p1557_p1 }
  0x64   :  { %1567 = shalt.err (!%p1564_p5)
}
  0x65   :  { %109 = dma.hbm_to_vmem [thread:$0]  %s1961_s12, 1024, %s1760_s7, [#allocation12], %s1966_s16, %s1966_s16, %s1603_s26  }
  0x66   :  { %1590 = dma.done.wait [#allocation3], 128  }
  0x67   :  { %1591 = vsyncadd [#allocation3], 4294967168 }
  0x68   :  { %1592 = dma.done.wait [#allocation6], 2048  }
  0x69   :  { %1593 = vsyncadd [#allocation6], 4294965248 }
  0x6a   :  { %1594 = dma.done.wait [#allocation9], 3072  }
  0x6b   :  { %1595 = vsyncadd [#allocation9], 4294964224 }
  0x6c   :  { %1596 = dma.done.wait [#allocation12], 1024  }
  0x6d   :  { %1597 = vsyncadd [#allocation12], 4294966272  ;;  %v1610_v0 = vmov 0.0   ;;  %vm1611_vm0 = vmmov 0   ;;  %v1343_v1 = vld [vmem:[%s1950_s1] sm:$0xff]   ;;  %v1344_v2 = vld [vmem:[%s1950_s1 + $0x8] sm:$0xff]  }
  0x6e   :  { %1208 = vmatprep.subr.bf16.mxu0 %v1610_v0  ;;  %1224 = vmatprep.mubr.msk.bf16.mxu0 %vm1611_vm0, %v1610_v0  ;;  %v1345_v3 = vld [vmem:[%s1950_s1 + $0x10] sm:$0xff]   ;;  %v1352_v4 = vld [vmem:[#allocation5] sm:$0xff]   ;;  %v1346_v5 = vld [vmem:[%s1950_s1 + $0x18] sm:$0xff]   ;;  %v1612_v60 = vmov 0   ;;  %vm753_vm1 = vcmask 7168   ;;  %vm854_vm2 = vcmask 1041409  }
  0x6f   :  { %1228 = vmatprep.subr.bf16.mxu1 %v1610_v0  ;;  %1244 = vmatprep.mubr.msk.bf16.mxu1 %vm1611_vm0, %v1610_v0  ;;  %v1353_v6 = vld [vmem:[#allocation5 + $0x8] sm:$0xff]   ;;  %v1347_v7 = vld [vmem:[%s1950_s1 + $0x20] sm:$0xff]   ;;  %v1354_v8 = vld [vmem:[#allocation5 + $0x10] sm:$0xff]  }
  0x70   :  { %1209 = vmatpush3.bf16.msra.mxu0 %v1343_v1  ;;  %1229 = vmatpush3.bf16.msra.mxu1 %v1352_v4  ;;  %v1348_v9 = vld [vmem:[%s1950_s1 + $0x28] sm:$0xff]   ;;  %v1355_v10 = vld [vmem:[#allocation5 + $0x18] sm:$0xff]   ;;  %v1349_v11 = vld [vmem:[%s1950_s1 + $0x30] sm:$0xff]  }
  0x71   :  { %1210 = vmatprep.subr.bf16.mxu0 %v1610_v0  ;;  %1230 = vmatprep.subr.bf16.mxu1 %v1610_v0  ;;  %v1356_v12 = vld [vmem:[#allocation5 + $0x20] sm:$0xff]   ;;  %v1350_v13 = vld [vmem:[%s1950_s1 + $0x38] sm:$0xff]   ;;  %v1357_v14 = vld [vmem:[#allocation5 + $0x28] sm:$0xff]   ;;  %s1613_s1 = smov [#allocation13]  }
  0x72   :  { %v1351_v15 = vld [vmem:[#allocation2] sm:$0xff]   ;;  %v1358_v16 = vld [vmem:[#allocation5 + $0x30] sm:$0xff]   ;;  %v1360_v18 = vld [vmem:[#allocation7] sm:$0xff]   ;;  %1342 = vset.pattern.permute.xlu0 %v1612_v60  ;;  %s1066_s20 = sshll.u32 %s1613_s1, 4  ;;  %s1067_s20 = int_to_ptr.vmem [resolvable:$true] %s1066_s20 }
  0x73   :  { %v1359_v17 = vld [vmem:[#allocation5 + $0x38] sm:$0xff]   ;;  %v1361_v19 = vld [vmem:[#allocation7 + $0x8] sm:$0xff]   ;;  %v1362_v20 = vld [vmem:[#allocation7 + $0x10] sm:$0xff]   ;;  %p1573_p7 = scmp.lt.s32.totalorder %s1067_s20, %s1067_s20 }
  0x74   :  { %1211 = vmatpush3.bf16.msra.mxu0 %v1344_v2  ;;  %1231 = vmatpush3.bf16.msra.mxu1 %v1353_v6  ;;  %v1363_v21 = vld [vmem:[#allocation7 + $0x18] sm:$0xff]   ;;  %v1364_v22 = vld [vmem:[#allocation7 + $0x20] sm:$0xff]   ;;  %v1365_v23 = vld [vmem:[#allocation7 + $0x28] sm:$0xff]  }
  0x75   :  { %1212 = vmatprep.subr.bf16.mxu0 %v1610_v0  ;;  %1232 = vmatprep.subr.bf16.mxu1 %v1610_v0  ;;  %v1078_v24 = vld [vmem:[%s1951_s2] ss:$0 sm:$0xff]  ;;  %v1366_v32 = vld [vmem:[#allocation7 + $0x30] sm:$0xff]   ;;  %v1368_v34 = vld [vmem:[#allocation8] ss:$8 sps:$4 sm:$0xff]  }
  0x76   :  { %v1367_v33 = vld [vmem:[#allocation7 + $0x38] sm:$0xff]   ;;  %v1370_v35 = vld [vmem:[#allocation8 + $0x4] ss:$8 sps:$4 sm:$0xff]   ;;  %v1374_v39 = vld [vmem:[#allocation8 + $0x20] ss:$8 sps:$4 sm:$0xff]  }
  0x77   :  { %v1373_v36 = vld [vmem:[#allocation8 + $0x14] ss:$8 sps:$4 sm:$0xff]   ;;  %v1371_v37 = vld [vmem:[#allocation8 + $0x10] ss:$8 sps:$4 sm:$0xff]   ;;  %v1376_v38 = vld [vmem:[#allocation8 + $0x24] ss:$8 sps:$4 sm:$0xff]  }
  0x78   :  { %1213 = vmatpush3.bf16.msra.mxu0 %v1345_v3  ;;  %1233 = vmatpush3.bf16.msra.mxu1 %v1354_v8  ;;  %v1379_v40 = vld [vmem:[#allocation8 + $0x34] ss:$8 sps:$4 sm:$0xff]   ;;  %v1377_v41 = vld [vmem:[#allocation8 + $0x30] ss:$8 sps:$4 sm:$0xff]   ;;  %v1382_v42 = vld [vmem:[#allocation8 + $0x44] ss:$8 sps:$4 sm:$0xff]  }
  0x79   :  { %1214 = vmatprep.subr.bf16.mxu0 %v1610_v0  ;;  %1234 = vmatprep.subr.bf16.mxu1 %v1610_v0  ;;  %v1380_v43 = vld [vmem:[#allocation8 + $0x40] ss:$8 sps:$4 sm:$0xff]   ;;  %v1385_v44 = vld [vmem:[#allocation8 + $0x54] ss:$8 sps:$4 sm:$0xff]   ;;  %v1383_v45 = vld [vmem:[#allocation8 + $0x50] ss:$8 sps:$4 sm:$0xff]  }
  0x7a   :  { %v1388_v46 = vld [vmem:[#allocation8 + $0x64] ss:$8 sps:$4 sm:$0xff]   ;;  %v1386_v47 = vld [vmem:[#allocation8 + $0x60] ss:$8 sps:$4 sm:$0xff]   ;;  %v1088_v48 = vld [vmem:[%s1953_s4] ss:$0 sm:$0xff] }
  0x7b   :  { %v1391_v58 = vld [vmem:[#allocation8 + $0x74] ss:$8 sps:$4 sm:$0xff]   ;;  %v1389_v59 = vld [vmem:[#allocation8 + $0x70] ss:$8 sps:$4 sm:$0xff]   ;;  %v1394_v8 = vld [vmem:[%s1958_s9 + $0x10] sm:$0xff]  }
  0x7c   :  { %1215 = vmatpush3.bf16.msra.mxu0 %v1346_v5  ;;  %1235 = vmatpush3.bf16.msra.mxu1 %v1355_v10  ;;  %v1097_v61 = vld [vmem:[%s1955_s6] ss:$0 sm:$0xff] }
  0x7d   :  { %1216 = vmatprep.subr.bf16.mxu0 %v1610_v0  ;;  %1236 = vmatprep.subr.bf16.mxu1 %v1610_v0  ;;  %v1392_v6 = vld [vmem:[%s1958_s9] sm:$0xff]  }
  0x7e   :  { %v1396_v10 = vld [vmem:[%s1958_s9 + $0x20] sm:$0xff]  }
  0x80   :  { %1217 = vmatpush3.bf16.msra.mxu0 %v1347_v7  ;;  %1237 = vmatpush3.bf16.msra.mxu1 %v1356_v12  ;;  %v1393_v7 = vld [vmem:[%s1958_s9 + $0x8] sm:$0xff]   ;;  %v1398_v12 = vld [vmem:[%s1958_s9 + $0x30] sm:$0xff]  }
  0x81   :  { %1218 = vmatprep.subr.bf16.mxu0 %v1610_v0  ;;  %1238 = vmatprep.subr.bf16.mxu1 %v1610_v0 }
  0x84   :  { %1219 = vmatpush3.bf16.msra.mxu0 %v1348_v9  ;;  %1239 = vmatpush3.bf16.msra.mxu1 %v1357_v14  ;;  %v1395_v9 = vld [vmem:[%s1958_s9 + $0x18] sm:$0xff]   ;;  %v498_v14 = vlaneseq }
  0x85   :  { %1220 = vmatprep.subr.bf16.mxu0 %v1610_v0  ;;  %1240 = vmatprep.subr.bf16.mxu1 %v1610_v0 }
  0x88   :  { %1221 = vmatpush3.bf16.msra.mxu0 %v1349_v11  ;;  %1241 = vmatpush3.bf16.msra.mxu1 %v1358_v16  ;;  %v1397_v11 = vld [vmem:[%s1958_s9 + $0x28] sm:$0xff]  }
  0x89   :  { %1222 = vmatprep.subr.bf16.mxu0 %v1610_v0  ;;  %1242 = vmatprep.subr.bf16.mxu1 %v1610_v0 }
  0x8c   :  { %1223 = vmatpush3.bf16.msra.mxu0 %v1350_v13  ;;  %1243 = vmatpush3.bf16.msra.mxu1 %v1359_v17  ;;  %v1399_v13 = vld [vmem:[%s1958_s9 + $0x38] sm:$0xff]   ;;  %v496_v17 = vld [vmem:[%s1957_s8] sm:$0x3] }
  0x8d   :  { %1248 = vmatprep.subr.bf16.mxu0 %v1610_v0  ;;  %588 = vmatprep.subr.bf16.mxu1 %v1370_v35 }
  0x8f   :  { %1225 = vmatmul.mubr.bf16.vlgmr.msra.gmra.mrb[0].mxu0 %v1351_v15  ;;  %v499_v15 = vshrl.u32 %v498_v14, 7 }
  0x90   :  { %1264 = vmatprep.mubr.msk.bf16.mxu0 %vm1611_vm0, %v1610_v0  ;;  %1249 = vmatpush3.bf16.msra.mxu0 %v1360_v18 }
  0x91   :  { %1250 = vmatprep.subr.bf16.mxu0 %v1610_v0  ;;  %v504_v16 = vsub.s32 1, %v499_v15 }
  0x93   :  { %v505_v18 = vrot.slane %v496_v17, %v504_v16 }
  0x94   :  { %1251 = vmatpush3.bf16.msra.mxu0 %v1361_v19 }
  0x95   :  { %1252 = vmatprep.subr.bf16.mxu0 %v1610_v0 }
  0x98   :  { %1253 = vmatpush3.bf16.msra.mxu0 %v1362_v20 }
  0x99   :  { %1254 = vmatprep.subr.bf16.mxu0 %v1610_v0 }
  0x9c   :  { %1255 = vmatpush3.bf16.msra.mxu0 %v1363_v21 }
  0x9d   :  { %1256 = vmatprep.subr.bf16.mxu0 %v1610_v0 }
  0xa0   :  { %1257 = vmatpush3.bf16.msra.mxu0 %v1364_v22 }
  0xa1   :  { %1258 = vmatprep.subr.bf16.mxu0 %v1610_v0 }
  0xa4   :  { %1259 = vmatpush3.bf16.msra.mxu0 %v1365_v23 }
  0xa5   :  { %1260 = vmatprep.subr.bf16.mxu0 %v1610_v0 }
  0xa8   :  { %1261 = vmatpush3.bf16.msra.mxu0 %v1366_v32 }
  0xa9   :  { %1262 = vmatprep.subr.bf16.mxu0 %v1610_v0 }
  0xac   :  { %1263 = vmatpush3.bf16.msra.mxu0 %v1367_v33 }
  0xad   :  { %1268 = vmatprep.subr.bf16.mxu0 %v1610_v0 }
 0x162   :  { %v244_v25 = vpop.f32.mrb[0].mxu0 }
 0x163   :  { %v1226_v26 = vpop.f32.mrb[1].mxu0  ;;  %v245_v28 = vadd.f32 %v1078_v24, %v244_v25 }
 0x164   :  { %v247_v27 = vpop.f32.mrb[2].mxu0  ;;  %v500_v26 = vsub.s32 0, %v499_v15 }
 0x165   :  { %v248_v29 = vadd.f32 %v1078_v24, %v247_v27  ;;  %v1227_v30 = vpop.f32.mrb[3].mxu0 }
 0x167   :  { %v251_v31 = vpack.c.bf16 %v248_v29, %v245_v28  ;;  %v501_v28 = vrot.slane %v496_v17, %v500_v26  ;;  %v1403_v26 = vld [vmem:[#allocation10 + $0x18] sm:$0xff]  }
 0x169   :  { %1245 = vmatmul.mubr.bf16.vlgmr.msra.gmra.mrb[0].mxu1 %v251_v31 }
 0x16a   :  { %589 = vmatpush1.bf16.msra.mxu1 %v1368_v34  ;;  %620 = vmatprep.mubr.bf16.mxu1 %v1612_v60 }
 0x16b   :  { %590 = vmatprep.subr.bf16.mxu1 %v1373_v36 }
 0x16e   :  { %591 = vmatpush1.bf16.msra.mxu1 %v1371_v37 }
 0x16f   :  { %592 = vmatprep.subr.bf16.mxu1 %v1376_v38 }
 0x172   :  { %593 = vmatpush1.bf16.msra.mxu1 %v1374_v39 }
 0x173   :  { %594 = vmatprep.subr.bf16.mxu1 %v1379_v40 }
 0x176   :  { %595 = vmatpush1.bf16.msra.mxu1 %v1377_v41 }
 0x177   :  { %596 = vmatprep.subr.bf16.mxu1 %v1382_v42  ;;  %v1400_v42 = vld [vmem:[#allocation10] sm:$0xff]  }
 0x17a   :  { %597 = vmatpush1.bf16.msra.mxu1 %v1380_v43  ;;  %v1401_v43 = vld [vmem:[#allocation10 + $0x8] sm:$0xff]  }
 0x17b   :  { %598 = vmatprep.subr.bf16.mxu1 %v1385_v44 }
 0x17e   :  { %599 = vmatpush1.bf16.msra.mxu1 %v1383_v45 }
 0x17f   :  { %600 = vmatprep.subr.bf16.mxu1 %v1388_v46 }
 0x182   :  { %601 = vmatpush1.bf16.msra.mxu1 %v1386_v47 }
 0x183   :  { %602 = vmatprep.subr.bf16.mxu1 %v1391_v58 }
 0x186   :  { %603 = vmatpush1.bf16.msra.mxu1 %v1389_v59 }
 0x187   :  { %1288 = vmatprep.subr.bf16.mxu1 %v1610_v0 }
 0x23c   :  { %v357_v49 = vpop.f32.mrb[0].mxu1 }
 0x23d   :  { %v358_v50 = vadd.f32 %v1088_v48, %v357_v49  ;;  %v1246_v51 = vpop.f32.mrb[1].mxu1 }
 0x23e   :  { %v360_v52 = vpop.f32.mrb[2].mxu1 }
 0x23f   :  { %v361_v53 = vadd.f32 %v1088_v48, %v360_v52  ;;  %v1247_v54 = vpop.f32.mrb[3].mxu1  ;;  %v364_v55 = vmax.f32 %v358_v50, 0.0 }
 0x241   :  { %v365_v56 = vmax.f32 %v361_v53, 0.0 }
 0x243   :  { %v366_v57 = vpack.c.bf16 %v365_v56, %v364_v55 }
 0x245   :  { %1265 = vmatmul.mubr.bf16.vlgmr.msra.gmra.mrb[4].mxu0 %v366_v57 }
 0x246   :  { %1284 = vmatprep.mubr.msk.bf16.mxu0 %vm1611_vm0, %v1610_v0  ;;  %1269 = vmatpush3.bf16.msra.mxu0 %v1392_v6 }
 0x247   :  { %1270 = vmatprep.subr.bf16.mxu0 %v1610_v0 }
 0x24a   :  { %1271 = vmatpush3.bf16.msra.mxu0 %v1393_v7 }
 0x24b   :  { %1272 = vmatprep.subr.bf16.mxu0 %v1610_v0 }
 0x24e   :  { %1273 = vmatpush3.bf16.msra.mxu0 %v1394_v8 }
 0x24f   :  { %1274 = vmatprep.subr.bf16.mxu0 %v1610_v0 }
 0x252   :  { %1275 = vmatpush3.bf16.msra.mxu0 %v1395_v9 }
 0x253   :  { %1276 = vmatprep.subr.bf16.mxu0 %v1610_v0 }
 0x256   :  { %1277 = vmatpush3.bf16.msra.mxu0 %v1396_v10 }
 0x257   :  { %1278 = vmatprep.subr.bf16.mxu0 %v1610_v0 }
 0x25a   :  { %1279 = vmatpush3.bf16.msra.mxu0 %v1397_v11 }
 0x25b   :  { %1280 = vmatprep.subr.bf16.mxu0 %v1610_v0 }
 0x25e   :  { %1281 = vmatpush3.bf16.msra.mxu0 %v1398_v12 }
 0x25f   :  { %1282 = vmatprep.subr.bf16.mxu0 %v1610_v0 }
 0x262   :  { %1283 = vmatpush3.bf16.msra.mxu0 %v1399_v13 }
 0x263   :  { %1308 = vmatprep.subr.bf16.mxu0 %v1610_v0 }
 0x318   :  { %v472_v62 = vpop.f32.mrb[4].mxu0 }
 0x319   :  { %v1266_v63 = vpop.f32.mrb[5].mxu0  ;;  %v1864_v2 = vadd.f32 %v1097_v61, %v472_v62 }
 0x31a   :  { %v475_v1 = vpop.f32.mrb[6].mxu0 }
 0x31b   :  { %v1866_v3 = vadd.f32 %v1097_v61, %v475_v1  ;;  %v1267_v4 = vpop.f32.mrb[7].mxu0 }
 0x31d   :  { %v479_v5 = vpack.c.bf16 %v1866_v3, %v1864_v2 }
 0x31f   :  { %621 = vmatmul.mubr.bf16.vlgmr.msra.gmra.mrb[4].mxu1 %v479_v5 }
 0x320   :  { %1304 = vmatprep.mubr.msk.bf16.mxu1 %vm1611_vm0, %v1610_v0  ;;  %1289 = vmatpush3.bf16.msra.mxu1 %v1400_v42 }
 0x321   :  { %1290 = vmatprep.subr.bf16.mxu1 %v1610_v0 }
 0x324   :  { %1291 = vmatpush3.bf16.msra.mxu1 %v1401_v43 }
 0x325   :  { %1292 = vmatprep.subr.bf16.mxu1 %v1610_v0 }
 0x3f2   :  { %v622_v19 = vpop.f32.mrb[4].mxu1 }
 0x3f3   :  { %v624_v20 = vpop.f32.mrb[5].mxu1  ;;  %v623_v29 = vadd.f32 %v622_v19, %v501_v28 }
 0x3f4   :  { %v625_v21 = vadd.f32 %v624_v20, %v505_v18  ;;  %v626_v22 = vpop.f32.mrb[6].mxu1 }
 0x3f5   :  { %v628_v23 = vpop.f32.mrb[7].mxu1  ;;  %v627_v31 = vadd.f32 %v626_v22, %v501_v28  ;;  %v1405_v28 = vld [vmem:[#allocation10 + $0x28] sm:$0xff]  }
 0x3f6   :  { %v1122_v24 = vmul.f32 -1.442695, %v625_v21  ;;  %v629_v25 = vadd.f32 %v628_v23, %v505_v18 }
 0x3f8   :  { %1416 = vpow2.f32 %v1122_v24  ;;  %v1123_v27 = vmul.f32 -1.442695, %v629_v25  ;;  %v1402_v24 = vld [vmem:[#allocation10 + $0x10] sm:$0xff]  }
 0x3f9   :  { %1293 = vmatpush3.bf16.msra.mxu1 %v1402_v24 }
 0x3fa   :  { %1418 = vpow2.f32 %v1123_v27  ;;  %1294 = vmatprep.subr.bf16.mxu1 %v1610_v0  ;;  %v1404_v27 = vld [vmem:[#allocation10 + $0x20] sm:$0xff]  }
 0x3fb   :  { %1420 = vtanh.f32 %v623_v29  ;;  %v1406_v29 = vld [vmem:[#allocation10 + $0x30] sm:$0xff]  }
 0x3fd   :  { %1295 = vmatpush3.bf16.msra.mxu1 %v1403_v26 }
 0x3fe   :  { %1296 = vmatprep.subr.bf16.mxu1 %v1610_v0 }
 0x401   :  { %1297 = vmatpush3.bf16.msra.mxu1 %v1404_v27 }
 0x402   :  { %v1417_v30 = vpop.eup %1416  ;;  %1298 = vmatprep.subr.bf16.mxu1 %v1610_v0 }
 0x403   :  { %v639_v32 = vadd.f32 1.0, %v1417_v30  ;;  %v1407_v30 = vld [vmem:[#allocation10 + $0x38] sm:$0xff]  }
 0x404   :  { %v1419_v33 = vpop.eup %1418 }
 0x405   :  { %1422 = vrcp.f32 %v639_v32  ;;  %v640_v34 = vadd.f32 1.0, %v1419_v33  ;;  %v1421_v35 = vpop.eup %1420  ;;  %1299 = vmatpush3.bf16.msra.mxu1 %v1405_v28  ;;  %v1409_v32 = vld [vmem:[#allocation11 + $0x8] sm:$0xff]   ;;  %v1410_v33 = vld [vmem:[#allocation11 + $0x10] sm:$0xff]  }
 0x406   :  { %1424 = vtanh.f32 %v627_v31  ;;  %1300 = vmatprep.subr.bf16.mxu1 %v1610_v0  ;;  %v1408_v31 = vld [vmem:[#allocation11] sm:$0xff]  }
 0x407   :  { %1426 = vrcp.f32 %v640_v34  ;;  %v1411_v34 = vld [vmem:[#allocation11 + $0x18] sm:$0xff]  }
 0x409   :  { %1301 = vmatpush3.bf16.msra.mxu1 %v1406_v29 }
 0x40a   :  { %1302 = vmatprep.subr.bf16.mxu1 %v1610_v0 }
 0x40d   :  { %1303 = vmatpush3.bf16.msra.mxu1 %v1407_v30 }
 0x40f   :  { %v1423_v36 = vpop.eup %1422 }
 0x410   :  { %v1425_v37 = vpop.eup %1424  ;;  %v645_v38 = vmul.f32 %v1423_v36, %v1421_v35  ;;  %v1412_v35 = vld [vmem:[#allocation11 + $0x20] sm:$0xff]   ;;  %v1413_v36 = vld [vmem:[#allocation11 + $0x28] sm:$0xff]  }
 0x411   :  { %v1427_v39 = vpop.eup %1426 }
 0x412   :  { %v646_v40 = vmul.f32 %v1427_v39, %v1425_v37  ;;  %v1152_v37 = vpack.c.bf16 %v1864_v2, %v1864_v2 }
 0x414   :  { %v647_v41 = vpack.c.bf16 %v646_v40, %v645_v38  ;;  %v1153_v38 = vpack.c.bf16 %v1866_v3, %v1866_v3  ;;  %v799_v39 = vunpack.c.l.bf16 %v1152_v37 }
 0x416   :  { %1285 = vmatmul.mubr.bf16.vlgmr.msra.gmra.mrb[8].mxu0 %v647_v41  ;;  %v800_v43 = vunpack.c.l.bf16 %v1153_v38 }
 0x417   :  { %1324 = vmatprep.mubr.msk.bf16.mxu0 %vm1611_vm0, %v1610_v0  ;;  %1309 = vmatpush3.bf16.msra.mxu0 %v1408_v31 }
 0x418   :  { %1310 = vmatprep.subr.bf16.mxu0 %v1610_v0 }
 0x41b   :  { %1311 = vmatpush3.bf16.msra.mxu0 %v1409_v32 }
 0x41c   :  { %1312 = vmatprep.subr.bf16.mxu0 %v1610_v0 }
 0x41f   :  { %1313 = vmatpush3.bf16.msra.mxu0 %v1410_v33 }
 0x420   :  { %1314 = vmatprep.subr.bf16.mxu0 %v1610_v0 }
 0x423   :  { %1315 = vmatpush3.bf16.msra.mxu0 %v1411_v34 }
 0x424   :  { %1316 = vmatprep.subr.bf16.mxu0 %v1610_v0 }
 0x427   :  { %1317 = vmatpush3.bf16.msra.mxu0 %v1412_v35 }
 0x428   :  { %1318 = vmatprep.subr.bf16.mxu0 %v1610_v0 }
 0x42b   :  { %1319 = vmatpush3.bf16.msra.mxu0 %v1413_v36 }
 0x42c   :  { %1320 = vmatprep.subr.bf16.mxu0 %v1610_v0 }
 0x4e9   :  { %v746_v44 = vpop.f32.mrb[8].mxu0 }
 0x4ea   :  { %v754_v45 = vsel %vm753_vm1, %v746_v44, -inf  ;;  %v1286_v46 = vpop.f32.mrb[9].mxu0 }
 0x4eb   :  { %v755_v47 = vrot.slane %v754_v45, 4  ;;  %v749_v48 = vpop.f32.mrb[10].mxu0 }
 0x4ec   :  { %v761_v49 = vsel %vm753_vm1, %v749_v48, -inf  ;;  %v1287_v50 = vpop.f32.mrb[11].mxu0 }
 0x4ed   :  { %v756_v51 = vmax.f32 %v754_v45, %v755_v47  ;;  %v762_v52 = vrot.slane %v761_v49, 4 }
 0x4ef   :  { %v757_v53 = vrot.slane %v756_v51, 2  ;;  %v763_v54 = vmax.f32 %v761_v49, %v762_v52 }
 0x4f1   :  { %v758_v55 = vmax.f32 %v756_v51, %v757_v53  ;;  %v764_v56 = vrot.slane %v763_v54, 2 }
 0x4f3   :  { %v759_v57 = vrot.slane %v758_v55, 1  ;;  %v765_v58 = vmax.f32 %v763_v54, %v764_v56 }
 0x4f5   :  { %v760_v59 = vmax.f32 %v758_v55, %v759_v57  ;;  %v766_v60 = vrot.slane %v765_v58, 1 }
 0x4f7   :  { %v768_v61 = vsub.f32 %v746_v44, %v760_v59  ;;  %v767_v62 = vmax.f32 %v765_v58, %v766_v60 }
 0x4f9   :  { %v770_v63 = vmul.f32 1.442695, %v768_v61  ;;  %v769_v1 = vsub.f32 %v749_v48, %v767_v62  ;;  %v1414_v61 = vld [vmem:[#allocation11 + $0x30] sm:$0xff]   ;;  %v1415_v62 = vld [vmem:[#allocation11 + $0x38] sm:$0xff]  }
 0x4fa   :  { %1321 = vmatpush3.bf16.msra.mxu0 %v1414_v61 }
 0x4fb   :  { %1428 = vpow2.f32 %v770_v63  ;;  %v772_v4 = vmul.f32 1.442695, %v769_v1  ;;  %1322 = vmatprep.subr.bf16.mxu0 %v1610_v0  ;;  %v1134_v63 = vld [vmem:[%s1960_s11] ss:$0 sm:$0xff]  ;;  %s1568_s11 = scalar_lea.vmem %s1067_s20, 32 }
 0x4fc   :  { %p1569_p6 = scmp.ne.s32.totalorder %s1067_s20, %s1568_s11  ;;  %p1574_p8 = scmp.lt.s32.totalorder %s1568_s11, %s1568_s11 }
 0x4fd   :  { %1430 = vpow2.f32 %v772_v4 }
 0x4fe   :  { %1323 = vmatpush3.bf16.msra.mxu0 %v1415_v62  ;;  %p1575_p9 = por %p1574_p8, %p1573_p7 }
 0x500   :  { %p1576_p10 = pnand %p1575_p9, %p1569_p6 }
 0x505   :  { %v1429_v5 = vpop.eup %1428 }
 0x506   :  { %v774_v6 = vsel %vm753_vm1, %v1429_v5, 0.0 }
 0x507   :  { %v1431_v7 = vpop.eup %1430  ;;  %v775_v8 = vrot.slane %v774_v6, 4 }
 0x508   :  { %v781_v9 = vsel %vm753_vm1, %v1431_v7, 0.0 }
 0x509   :  { %v776_v10 = vadd.f32 %v775_v8, %v774_v6  ;;  %v782_v11 = vrot.slane %v781_v9, 4 }
 0x50b   :  { %v777_v12 = vrot.slane %v776_v10, 2  ;;  %v783_v13 = vadd.f32 %v782_v11, %v781_v9 }
 0x50d   :  { %v778_v14 = vadd.f32 %v777_v12, %v776_v10  ;;  %v784_v15 = vrot.slane %v783_v13, 2  ;;  %v1143_v10 = vld [vmem:[%s1962_s13] ss:$0 sm:$0xff] }
 0x50f   :  { %v779_v16 = vrot.slane %v778_v14, 1  ;;  %v785_v17 = vadd.f32 %v784_v15, %v783_v13 }
 0x511   :  { %v780_v18 = vadd.f32 %v779_v16, %v778_v14  ;;  %v786_v19 = vrot.slane %v785_v17, 1 }
 0x513   :  { %1432 = vrcp.f32 %v780_v18  ;;  %v787_v20 = vadd.f32 %v786_v19, %v785_v17 }
 0x515   :  { %1434 = vrcp.f32 %v787_v20 }
 0x51d   :  { %v1433_v21 = vpop.eup %1432 }
 0x51e   :  { %v790_v22 = vmul.f32 %v1433_v21, %v1429_v5 }
 0x51f   :  { %v1435_v23 = vpop.eup %1434 }
 0x520   :  { %803 = vperm.xlu0 %1342, %v790_v22   ;;  %v791_v25 = vmul.f32 %v1435_v23, %v1431_v7 }
 0x524   :  { %808 = vperm.xlu0 %1342, %v791_v25  }
 0x59f   :  { %v804_v40 = vpop.permute.xlu0 %803 }
 0x5a0   :  { %v811_v41 = vmul.f32 %v804_v40, %v799_v39 }
 0x5a2   :  { %v813_v42 = vrot.slane %v811_v41, 4 }
 0x5a3   :  { %v809_v44 = vpop.permute.xlu0 %808 }
 0x5a4   :  { %v814_v45 = vadd.f32 %v813_v42, %v811_v41  ;;  %v812_v46 = vmul.f32 %v809_v44, %v800_v43 }
 0x5a6   :  { %v815_v47 = vrot.slane %v814_v45, 2  ;;  %v819_v48 = vrot.slane %v812_v46, 4 }
 0x5a8   :  { %v816_v49 = vadd.f32 %v815_v47, %v814_v45  ;;  %v820_v50 = vadd.f32 %v819_v48, %v812_v46 }
 0x5aa   :  { %v817_v51 = vrot.slane %v816_v49, 1  ;;  %v821_v52 = vrot.slane %v820_v50, 2 }
 0x5ac   :  { %v818_v53 = vadd.f32 %v817_v51, %v816_v49  ;;  %v822_v54 = vadd.f32 %v821_v52, %v820_v50 }
 0x5ae   :  { %v823_v2 = vrot.slane %v822_v54, 1  ;;  %v825_v55 = vpack.c.bf16 %v818_v53, %v818_v53 }
 0x5b0   :  { %v824_v56 = vadd.f32 %v823_v2, %v822_v54  ;;  %v852_v57 = vunpack.c.l.b16 %v825_v55 }
 0x5b2   :  { %v826_v3 = vpack.c.bf16 %v824_v56, %v824_v56 }
 0x5b4   :  { %v853_v58 = vunpack.c.l.b16 %v826_v3 }
 0x5b6   :  { %v855_v59 = vsel %vm854_vm2, %v853_v58, %v852_v57 }
 0x5b7   :  { %v856_v60 = vpack.c.b16 %v855_v59, %v855_v59 }
 0x5b9   :  { %1305 = vmatmul.mubr.bf16.vlgmr.msra.gmra.mrb[8].mxu1 %v856_v60 }
 0x68c   :  { %v940_v1 = vpop.f32.mrb[8].mxu1 }
 0x68d   :  { %v941_v4 = vadd.f32 %v1134_v63, %v940_v1  ;;  %v1306_v5 = vpop.f32.mrb[9].mxu1 }
 0x68e   :  { %v943_v6 = vpop.f32.mrb[10].mxu1 }
 0x68f   :  { %v946_v7 = vmax.f32 %v941_v4, 0.0  ;;  %v1307_v8 = vpop.f32.mrb[11].mxu1 }
 0x691   :  { %v947_v9 = vpack.c.bf16 %v946_v7, %v946_v7 }
 0x693   :  { %1325 = vmatmul.mubr.bf16.vlgmr.msra.gmra.mrb[12].mxu0 %v947_v9 }
 0x766   :  { %v1053_v0 = vpop.f32.mrb[12].mxu0 }
 0x767   :  { %v1054_v11 = vadd.f32 %v1143_v10, %v1053_v0  ;;  %v1326_v12 = vpop.f32.mrb[13].mxu0 }
 0x768   :  { %v1056_v13 = vpop.f32.mrb[14].mxu0 }
 0x769   :  { %1059 = vst [vmem:[#allocation13] sm:$0x3] %v1054_v11  ;;  %v1327_v14 = vpop.f32.mrb[15].mxu0 }
 0x76a   :  { %1579 = shalt.err (!%p1576_p10)
}
 0x76b   :  { %s1580_s13 = scalar_lea.hbm %s1963_s14, 32 }
 0x76c   :  { %p1581_p11 = scmp.ne.s32.totalorder %s1963_s14, %s1580_s13  ;;  %p1584_p12 = scmp.lt.u32.totalorder %s1580_s13, %s1963_s14 }
 0x76e   :  { %p1586_p13 = pnand %p1584_p12, %p1581_p11 }
 0x770   :  { %1589 = shalt.err (!%p1586_p13)
}
 0x771   :  { %1069 = dma.vmem_to_hbm [thread:$0]  %s1067_s20, 32, %s1963_s14, [#allocation4]  }
 0x772   :  { %1598 = dma.done.wait [#allocation4], 32  }
 0x773   :  { %1599 = vsyncadd [#allocation4], 4294967264 }
 0x774   :  { %1073 = vsyncpa [#allocation3], 1 }
 0x775   :  { %1074 = vsyncpa [#allocation6], 1 }
 0x776   :  { %1075 = vsyncpa [#allocation9], 1 }
 0x777   :  { %1076 = vsyncpa [#allocation12], 1 }
 0x778   :  { %1077 = vsyncpa [#allocation4], 1 }

</bundles_post_ra>
